<compile_context>
chip_gen: v7x
topology: tpu7x:2x2x1
jax: 0.10.0
libtpu: 0.0.40
codegen_flags: <defaults>
</compile_context>

<pallas_src>
import functools

import numpy as np
import jax
import jax.numpy as jnp
from jax.experimental import pallas as pl
from jax.experimental.pallas import tpu as pltpu

LANE = 128   # TPU lane width: every channel / hidden / output dim padded to this.
SUB = 8      # sublane tile height: the batch slot is padded to this.


def _round_up(x, m):
    return ((x + m - 1) // m) * m


# ----------------------------------------------------------------------------
# Fused kernel: conv0 -> conv1 -> fc0(ReLU) -> fc1, five lane-dense matmuls.
# ----------------------------------------------------------------------------
def _fused_forward_kernel(p0_ref, w0_ref, b0_ref, gcat_ref, w1_ref, b1_ref,
                          w2_ref, b2_ref, w3_ref, b3_ref, o_ref):
    f32 = jnp.float32
    bf16 = jnp.bfloat16
    lane = w0_ref.shape[1]                     # 128
    n_taps = w1_ref.shape[0] // lane           # 9 conv1 kernel taps
    m1 = gcat_ref.shape[0] // n_taps           # n_pos * b_pad conv1 output rows
    n_pos = w2_ref.shape[0] // lane            # conv1 spatial positions (16)
    b_pad = m1 // n_pos                        # padded batch slot (8)

    # ---- conv0: im2col patches @ W0 + b, ReLU ------------------------------
    h0 = jnp.dot(p0_ref[...], w0_ref[...], preferred_element_type=f32)
    h0 = jnp.maximum(h0 + b0_ref[...], 0.0).astype(bf16)           # [m0, 128]

    # ---- conv1: ONE 0/1 gather matmul + ONE stacked tap-weight matmul ------
    # gcat rows are ordered (tap, pos, batch_slot); all-zero rows implement the
    # zero padding and the unused batch slots.  Gather of bf16 values is exact.
    taps = jnp.dot(gcat_ref[...], h0, preferred_element_type=f32).astype(bf16)
    taps_cat = jnp.concatenate(                                     # [m1, 9*128]
        [taps[t * m1:(t + 1) * m1, :] for t in range(n_taps)], axis=1)
    h1 = jnp.dot(taps_cat, w1_ref[...], preferred_element_type=f32)
    h1 = jnp.maximum(h1 + b1_ref[...], 0.0).astype(bf16)           # [m1, 128]

    # ---- fc0: NCHW flatten = tile-aligned lane concat, then ONE matmul -----
    # h1 rows are (pos, batch_slot) with batch_slot padded to a sublane tile,
    # so every slice below is a full (8,128)-aligned tile: no masked extracts.
    h1_flat = jnp.concatenate(                                      # [b_pad, n_pos*128]
        [h1[p * b_pad:(p + 1) * b_pad, :] for p in range(n_pos)], axis=1)
    h2 = jnp.dot(h1_flat, w2_ref[...], preferred_element_type=f32)
    h2 = jnp.maximum(h2 + b2_ref[...], 0.0).astype(bf16)           # [b_pad, 128]

    # ---- fc1 (no nonlinearity): lane-dense 128-wide store -------------------
    out = jnp.dot(h2, w3_ref[...], preferred_element_type=f32) + b3_ref[...]
    o_ref[...] = out.astype(o_ref.dtype)


# ----------------------------------------------------------------------------
# Host-side glue: im2col of the NETWORK INPUT only (a few KB, one XLA fusion).
# ----------------------------------------------------------------------------
def _im2col_input(x_nchw, k, stride, pad):
    """x [B,C,H,W] -> bf16 patches [B*Ho*Wo, LANE]; element order (ki,kj,c)."""
    B, C, H, W = x_nchw.shape
    x = jnp.transpose(x_nchw, (0, 2, 3, 1))                    # NCHW -> NHWC
    xp = jnp.pad(x, ((0, 0), (pad, pad), (pad, pad), (0, 0)))
    Ho = (H + 2 * pad - k) // stride + 1
    Wo = (W + 2 * pad - k) // stride + 1
    cols = [xp[:, i:i + stride * Ho:stride, j:j + stride * Wo:stride, :]
            for i in range(k) for j in range(k)]
    p = jnp.stack(cols, axis=3).reshape(B * Ho * Wo, k * k * C)
    p = jnp.pad(p, ((0, 0), (0, LANE - k * k * C)))            # lane-dense K
    return p.astype(jnp.bfloat16)


def fused_forward(x_nchw, prep, *, k0, s0, p0, output_size):
    """Full Conv2dHeadModel forward in one pallas_call. Returns [B, out] f32."""
    batch = x_nchw.shape[0]
    b_pad = _round_up(batch, SUB)
    patches0 = _im2col_input(x_nchw, k0, s0, p0)               # [B*HO0*WO0, 128] bf16
    args = (patches0, prep["w0"], prep["b0"], prep["gcat"], prep["w1"],
            prep["b1"], prep["w2"], prep["b2"], prep["w3"], prep["b3"])
    out = pl.pallas_call(
        _fused_forward_kernel,
        out_shape=jax.ShapeDtypeStruct((b_pad, LANE), jnp.float32),
        in_specs=[pl.BlockSpec(memory_space=pltpu.MemorySpace.VMEM)
                  for _ in args],
        out_specs=pl.BlockSpec(memory_space=pltpu.MemorySpace.VMEM),
    )(*args)
    return out[:batch, :output_size]                           # lane-dense store, slice outside


# ----------------------------------------------------------------------------
# One-time parameter preparation (all transposes / pads hoisted out of forward).
# ----------------------------------------------------------------------------
def prepare_params(params, *, image_shape, channels, kernel_sizes, strides,
                   paddings, hidden, output_size, batch):
    bf16 = jnp.bfloat16
    c_in, h, w = image_shape
    c0_ch, c1_ch = channels
    k0, k1 = kernel_sizes
    s0, s1 = strides
    p0, p1 = paddings
    ho0 = (h + 2 * p0 - k0) // s0 + 1
    wo0 = (w + 2 * p0 - k0) // s0 + 1
    ho1 = (ho0 + 2 * p1 - k1) // s1 + 1
    wo1 = (wo0 + 2 * p1 - k1) // s1 + 1
    assert k0 * k0 * c_in <= LANE and c0_ch <= LANE and c1_ch <= LANE
    assert hidden <= LANE and output_size <= LANE

    b_pad = _round_up(batch, SUB)
    n_taps = k1 * k1
    n_pos = ho1 * wo1                 # conv1 spatial positions (16)
    m1 = n_pos * b_pad                # conv1 rows, ordered (pos, batch_slot)
    m0 = batch * ho0 * wo0            # conv0 rows, ordered (batch, pos0)

    # conv0 weight -> [LANE, LANE]: rows (ki,kj,ic), cols = out channel (padded).
    w0 = jnp.transpose(params["conv0_w"], (2, 3, 1, 0)).reshape(k0 * k0 * c_in, c0_ch)
    w0 = jnp.pad(w0, ((0, LANE - k0 * k0 * c_in), (0, LANE - c0_ch))).astype(bf16)
    b0 = jnp.pad(params["conv0_b"], (0, LANE - c0_ch)).reshape(1, LANE)

    # conv1 gather matrix: row (t*m1 + pos*b_pad + b) selects the conv0 row that
    # kernel tap t of conv1 output position pos needs for batch b; all-zero rows
    # implement zero padding and unused batch slots.  0/1 values: exact in bf16.
    g = np.zeros((n_taps, m1, m0), np.float32)
    for ki in range(k1):
        for kj in range(k1):
            t = ki * k1 + kj
            for oh in range(ho1):
                for ow in range(wo1):
                    r = s1 * oh + ki - p1
                    c = s1 * ow + kj - p1
                    if 0 <= r < ho0 and 0 <= c < wo0:
                        for b in range(batch):
                            m = (oh * wo1 + ow) * b_pad + b
                            g[t, m, b * ho0 * wo0 + r * wo0 + c] = 1.0
    gcat = jnp.asarray(g.reshape(n_taps * m1, m0), dtype=bf16)

    # conv1 weight, all taps stacked: [n_taps*LANE, LANE], rows (tap, in_chan).
    w1 = jnp.transpose(params["conv1_w"], (2, 3, 1, 0)).reshape(n_taps, c0_ch, c1_ch)
    w1 = jnp.pad(w1, ((0, 0), (0, LANE - c0_ch), (0, LANE - c1_ch)))
    w1 = w1.reshape(n_taps * LANE, LANE).astype(bf16)
    b1 = jnp.pad(params["conv1_b"], (0, LANE - c1_ch)).reshape(1, LANE)

    # fc0: torch weight is [hidden, C1*HO1*WO1] over NCHW-flattened features
    # (f = c1*n_pos + pos).  Regroup + pad to [n_pos*LANE, LANE] so the kernel's
    # lane-concat flatten (rows ordered (pos, batch_slot)) hits the right rows.
    w2 = jnp.transpose(params["fc0_w"].reshape(hidden, c1_ch, n_pos), (2, 1, 0))
    w2 = jnp.pad(w2, ((0, 0), (0, LANE - c1_ch), (0, LANE - hidden)))
    w2 = w2.reshape(n_pos * LANE, LANE).astype(bf16)
    b2 = jnp.pad(params["fc0_b"], (0, LANE - hidden)).reshape(1, LANE)

    # fc1: [LANE, LANE]; rows beyond `hidden` and cols beyond `output_size` are
    # zero, keeping the output store 128-lane dense (sliced outside the kernel).
    w3 = jnp.pad(jnp.transpose(params["fc1_w"]),
                 ((0, LANE - hidden), (0, LANE - output_size))).astype(bf16)
    b3 = jnp.pad(params["fc1_b"], (0, LANE - output_size)).reshape(1, LANE)

    return dict(w0=w0, b0=b0, gcat=gcat, w1=w1, b1=b1, w2=w2, b2=b2, w3=w3, b3=b3)


# ----------------------------------------------------------------------------
# Deterministic synthetic parameters in torch layout.
# ----------------------------------------------------------------------------
def make_params(key, *, image_shape, channels, kernel_sizes, hidden, output_size,
                conv_out_size):
    keys = iter(jax.random.split(key, 2 * (len(channels) + 2)))
    params = {}
    ic = image_shape[0]
    for li, (oc, k) in enumerate(zip(channels, kernel_sizes)):
        params[f"conv{li}_w"] = 0.1 * jax.random.normal(next(keys), (oc, ic, k, k),
                                                        jnp.float32)
        params[f"conv{li}_b"] = 0.1 * jax.random.normal(next(keys), (oc,), jnp.float32)
        ic = oc
    params["fc0_w"] = 0.1 * jax.random.normal(next(keys), (hidden, conv_out_size),
                                              jnp.float32)
    params["fc0_b"] = 0.1 * jax.random.normal(next(keys), (hidden,), jnp.float32)
    params["fc1_w"] = 0.1 * jax.random.normal(next(keys), (output_size, hidden),
                                              jnp.float32)
    params["fc1_b"] = 0.1 * jax.random.normal(next(keys), (output_size,), jnp.float32)
    return params


# ----------------------------------------------------------------------------
# Pure-JAX f32 reference (torch semantics) for correctness checking.
# ----------------------------------------------------------------------------
def reference_forward(x, params, *, strides, paddings):
    hi = jax.lax.Precision.HIGHEST
    y = x
    for li, (s, p) in enumerate(zip(strides, paddings)):
        wgt = params[f"conv{li}_w"]
        b = params[f"conv{li}_b"]
        y = jax.lax.conv_general_dilated(
            y, wgt, window_strides=(s, s), padding=((p, p), (p, p)),
            dimension_numbers=("NCHW", "OIHW", "NCHW"), precision=hi)
        y = jnp.maximum(y + b.reshape(1, -1, 1, 1), 0.0)
    y = y.reshape(y.shape[0], -1)                               # NCHW flatten
    y = jnp.maximum(jnp.dot(y, params["fc0_w"].T, precision=hi) + params["fc0_b"], 0.0)
    return jnp.dot(y, params["fc1_w"].T, precision=hi) + params["fc1_b"]


if __name__ == "__main__":
    batch = 2
    image_shape = (4, 16, 16)                 # (C, H, W)
    channels = [8, 16]
    kernel_sizes = [3, 3]
    strides = [2, 2]
    paddings = [1, 1]
    hidden_sizes = [32]
    output_size = 10

    # conv_out_size (matches Conv2dModel.conv_out_size): 16 -> 8 -> 4 spatially.
    _, h, w = image_shape
    for k, s, p in zip(kernel_sizes, strides, paddings):
        h = (h + 2 * p - k) // s + 1
        w = (w + 2 * p - k) // s + 1
    conv_out_size = h * w * channels[-1]      # 4*4*16 = 256

    key = jax.random.PRNGKey(0)
    k_params, k_input = jax.random.split(key)
    params = make_params(k_params, image_shape=image_shape, channels=channels,
                         kernel_sizes=kernel_sizes, hidden=hidden_sizes[0],
                         output_size=output_size, conv_out_size=conv_out_size)
    prep = prepare_params(params, image_shape=image_shape, channels=channels,
                          kernel_sizes=kernel_sizes, strides=strides,
                          paddings=paddings, hidden=hidden_sizes[0],
                          output_size=output_size, batch=batch)

    x = jax.random.normal(k_input, (batch, *image_shape), jnp.float32)  # [B,C,H,W]

    fwd = jax.jit(functools.partial(fused_forward, k0=kernel_sizes[0],
                                    s0=strides[0], p0=paddings[0],
                                    output_size=output_size))
    out = fwd(x, prep)
    jax.block_until_ready(out)
    assert out.shape == (batch, output_size), out.shape
    assert out.dtype == jnp.float32

    ref = reference_forward(x, params, strides=strides, paddings=paddings)
    max_err = float(jnp.max(jnp.abs(out - ref)))
    # bf16 MXU operands with f32 accumulation: ~1e-2-scale tolerance vs f32 ref.
    assert jnp.allclose(out, ref, rtol=2e-2, atol=2e-2), max_err
    print("KERNEL_OK")
</pallas_src>

<mosaic_0001>
module attributes {stable_mosaic.version = 11 : i64} {
  func.func @_fused_forward_kernel(%arg0: memref<128x128xbf16, #tpu.memory_space<vmem>>, %arg1: memref<128x128xbf16, #tpu.memory_space<vmem>>, %arg2: memref<1x128xf32, #tpu.memory_space<vmem>>, %arg3: memref<1152x128xbf16, #tpu.memory_space<vmem>>, %arg4: memref<1152x128xbf16, #tpu.memory_space<vmem>>, %arg5: memref<1x128xf32, #tpu.memory_space<vmem>>, %arg6: memref<2048x128xbf16, #tpu.memory_space<vmem>>, %arg7: memref<1x128xf32, #tpu.memory_space<vmem>>, %arg8: memref<128x128xbf16, #tpu.memory_space<vmem>>, %arg9: memref<1x128xf32, #tpu.memory_space<vmem>>, %arg10: memref<8x128xf32, #tpu.memory_space<vmem>>) attributes {dimension_semantics = [], scalar_prefetch = 0 : i64, scratch_operands = 0 : i64, tpu.core_type = #tpu.core_type<tc>} {
    %c0 = arith.constant 0 : index
    %c0_0 = arith.constant 0 : index
    %0 = vector.load %arg0[%c0, %c0_0] : memref<128x128xbf16, #tpu.memory_space<vmem>>, vector<128x128xbf16>
    %c0_1 = arith.constant 0 : index
    %c0_2 = arith.constant 0 : index
    %1 = vector.load %arg1[%c0_1, %c0_2] : memref<128x128xbf16, #tpu.memory_space<vmem>>, vector<128x128xbf16>
    %cst = arith.constant dense<0.000000e+00> : vector<128x128xf32>
    %2 = tpu.matmul %0, %1, %cst {dimension_numbers = #tpu.dot_dimension_numbers<[1], [0], [0], [1], [0, 0, 1, 1], [], []>} : vector<128x128xbf16>, vector<128x128xbf16>, vector<128x128xf32> -> vector<128x128xf32>
    %c0_3 = arith.constant 0 : index
    %c0_4 = arith.constant 0 : index
    %3 = vector.load %arg2[%c0_3, %c0_4] : memref<1x128xf32, #tpu.memory_space<vmem>>, vector<1x128xf32>
    %4 = vector.broadcast %3 : vector<1x128xf32> to vector<128x128xf32>
    %5 = arith.addf %2, %4 : vector<128x128xf32>
    %cst_5 = arith.constant 0.000000e+00 : f32
    %6 = vector.broadcast %cst_5 : f32 to vector<128x128xf32>
    %7 = arith.maximumf %5, %6 : vector<128x128xf32>
    %8 = arith.truncf %7 : vector<128x128xf32> to vector<128x128xbf16>
    %c0_6 = arith.constant 0 : index
    %c0_7 = arith.constant 0 : index
    %9 = vector.load %arg3[%c0_6, %c0_7] : memref<1152x128xbf16, #tpu.memory_space<vmem>>, vector<1152x128xbf16>
    %cst_8 = arith.constant dense<0.000000e+00> : vector<1152x128xf32>
    %10 = tpu.matmul %9, %8, %cst_8 {dimension_numbers = #tpu.dot_dimension_numbers<[1], [0], [0], [1], [0, 0, 1, 1], [], []>} : vector<1152x128xbf16>, vector<128x128xbf16>, vector<1152x128xf32> -> vector<1152x128xf32>
    %11 = arith.truncf %10 : vector<1152x128xf32> to vector<1152x128xbf16>
    %12 = vector.extract_strided_slice %11 {offsets = [0, 0], sizes = [128, 128], strides = [1, 1]} : vector<1152x128xbf16> to vector<128x128xbf16>
    %13 = vector.extract_strided_slice %11 {offsets = [128, 0], sizes = [128, 128], strides = [1, 1]} : vector<1152x128xbf16> to vector<128x128xbf16>
    %14 = vector.extract_strided_slice %11 {offsets = [256, 0], sizes = [128, 128], strides = [1, 1]} : vector<1152x128xbf16> to vector<128x128xbf16>
    %15 = vector.extract_strided_slice %11 {offsets = [384, 0], sizes = [128, 128], strides = [1, 1]} : vector<1152x128xbf16> to vector<128x128xbf16>
    %16 = vector.extract_strided_slice %11 {offsets = [512, 0], sizes = [128, 128], strides = [1, 1]} : vector<1152x128xbf16> to vector<128x128xbf16>
    %17 = vector.extract_strided_slice %11 {offsets = [640, 0], sizes = [128, 128], strides = [1, 1]} : vector<1152x128xbf16> to vector<128x128xbf16>
    %18 = vector.extract_strided_slice %11 {offsets = [768, 0], sizes = [128, 128], strides = [1, 1]} : vector<1152x128xbf16> to vector<128x128xbf16>
    %19 = vector.extract_strided_slice %11 {offsets = [896, 0], sizes = [128, 128], strides = [1, 1]} : vector<1152x128xbf16> to vector<128x128xbf16>
    %20 = vector.extract_strided_slice %11 {offsets = [1024, 0], sizes = [128, 128], strides = [1, 1]} : vector<1152x128xbf16> to vector<128x128xbf16>
    %21 = tpu.concatenate %12, %13, %14, %15, %16, %17, %18, %19, %20 in 1 : vector<128x128xbf16>, vector<128x128xbf16>, vector<128x128xbf16>, vector<128x128xbf16>, vector<128x128xbf16>, vector<128x128xbf16>, vector<128x128xbf16>, vector<128x128xbf16>, vector<128x128xbf16> -> vector<128x1152xbf16>
    %c0_9 = arith.constant 0 : index
    %c0_10 = arith.constant 0 : index
    %22 = vector.load %arg4[%c0_9, %c0_10] : memref<1152x128xbf16, #tpu.memory_space<vmem>>, vector<1152x128xbf16>
    %cst_11 = arith.constant dense<0.000000e+00> : vector<128x128xf32>
    %23 = tpu.matmul %21, %22, %cst_11 {dimension_numbers = #tpu.dot_dimension_numbers<[1], [0], [0], [1], [0, 0, 1, 1], [], []>} : vector<128x1152xbf16>, vector<1152x128xbf16>, vector<128x128xf32> -> vector<128x128xf32>
    %c0_12 = arith.constant 0 : index
    %c0_13 = arith.constant 0 : index
    %24 = vector.load %arg5[%c0_12, %c0_13] : memref<1x128xf32, #tpu.memory_space<vmem>>, vector<1x128xf32>
    %25 = vector.broadcast %24 : vector<1x128xf32> to vector<128x128xf32>
    %26 = arith.addf %23, %25 : vector<128x128xf32>
    %cst_14 = arith.constant 0.000000e+00 : f32
    %27 = vector.broadcast %cst_14 : f32 to vector<128x128xf32>
    %28 = arith.maximumf %26, %27 : vector<128x128xf32>
    %29 = arith.truncf %28 : vector<128x128xf32> to vector<128x128xbf16>
    %30 = vector.extract_strided_slice %29 {offsets = [0, 0], sizes = [8, 128], strides = [1, 1]} : vector<128x128xbf16> to vector<8x128xbf16>
    %31 = vector.extract_strided_slice %29 {offsets = [8, 0], sizes = [8, 128], strides = [1, 1]} : vector<128x128xbf16> to vector<8x128xbf16>
    %32 = vector.extract_strided_slice %29 {offsets = [16, 0], sizes = [8, 128], strides = [1, 1]} : vector<128x128xbf16> to vector<8x128xbf16>
    %33 = vector.extract_strided_slice %29 {offsets = [24, 0], sizes = [8, 128], strides = [1, 1]} : vector<128x128xbf16> to vector<8x128xbf16>
    %34 = vector.extract_strided_slice %29 {offsets = [32, 0], sizes = [8, 128], strides = [1, 1]} : vector<128x128xbf16> to vector<8x128xbf16>
    %35 = vector.extract_strided_slice %29 {offsets = [40, 0], sizes = [8, 128], strides = [1, 1]} : vector<128x128xbf16> to vector<8x128xbf16>
    %36 = vector.extract_strided_slice %29 {offsets = [48, 0], sizes = [8, 128], strides = [1, 1]} : vector<128x128xbf16> to vector<8x128xbf16>
    %37 = vector.extract_strided_slice %29 {offsets = [56, 0], sizes = [8, 128], strides = [1, 1]} : vector<128x128xbf16> to vector<8x128xbf16>
    %38 = vector.extract_strided_slice %29 {offsets = [64, 0], sizes = [8, 128], strides = [1, 1]} : vector<128x128xbf16> to vector<8x128xbf16>
    %39 = vector.extract_strided_slice %29 {offsets = [72, 0], sizes = [8, 128], strides = [1, 1]} : vector<128x128xbf16> to vector<8x128xbf16>
    %40 = vector.extract_strided_slice %29 {offsets = [80, 0], sizes = [8, 128], strides = [1, 1]} : vector<128x128xbf16> to vector<8x128xbf16>
    %41 = vector.extract_strided_slice %29 {offsets = [88, 0], sizes = [8, 128], strides = [1, 1]} : vector<128x128xbf16> to vector<8x128xbf16>
    %42 = vector.extract_strided_slice %29 {offsets = [96, 0], sizes = [8, 128], strides = [1, 1]} : vector<128x128xbf16> to vector<8x128xbf16>
    %43 = vector.extract_strided_slice %29 {offsets = [104, 0], sizes = [8, 128], strides = [1, 1]} : vector<128x128xbf16> to vector<8x128xbf16>
    %44 = vector.extract_strided_slice %29 {offsets = [112, 0], sizes = [8, 128], strides = [1, 1]} : vector<128x128xbf16> to vector<8x128xbf16>
    %45 = vector.extract_strided_slice %29 {offsets = [120, 0], sizes = [8, 128], strides = [1, 1]} : vector<128x128xbf16> to vector<8x128xbf16>
    %46 = tpu.concatenate %30, %31, %32, %33, %34, %35, %36, %37, %38, %39, %40, %41, %42, %43, %44, %45 in 1 : vector<8x128xbf16>, vector<8x128xbf16>, vector<8x128xbf16>, vector<8x128xbf16>, vector<8x128xbf16>, vector<8x128xbf16>, vector<8x128xbf16>, vector<8x128xbf16>, vector<8x128xbf16>, vector<8x128xbf16>, vector<8x128xbf16>, vector<8x128xbf16>, vector<8x128xbf16>, vector<8x128xbf16>, vector<8x128xbf16>, vector<8x128xbf16> -> vector<8x2048xbf16>
    %c0_15 = arith.constant 0 : index
    %c0_16 = arith.constant 0 : index
    %47 = vector.load %arg6[%c0_15, %c0_16] : memref<2048x128xbf16, #tpu.memory_space<vmem>>, vector<2048x128xbf16>
    %cst_17 = arith.constant dense<0.000000e+00> : vector<8x128xf32>
    %48 = tpu.matmul %46, %47, %cst_17 {dimension_numbers = #tpu.dot_dimension_numbers<[1], [0], [0], [1], [0, 0, 1, 1], [], []>} : vector<8x2048xbf16>, vector<2048x128xbf16>, vector<8x128xf32> -> vector<8x128xf32>
    %c0_18 = arith.constant 0 : index
    %c0_19 = arith.constant 0 : index
    %49 = vector.load %arg7[%c0_18, %c0_19] : memref<1x128xf32, #tpu.memory_space<vmem>>, vector<1x128xf32>
    %50 = vector.broadcast %49 : vector<1x128xf32> to vector<8x128xf32>
    %51 = arith.addf %48, %50 : vector<8x128xf32>
    %cst_20 = arith.constant 0.000000e+00 : f32
    %52 = vector.broadcast %cst_20 : f32 to vector<8x128xf32>
    %53 = arith.maximumf %51, %52 : vector<8x128xf32>
    %54 = arith.truncf %53 : vector<8x128xf32> to vector<8x128xbf16>
    %c0_21 = arith.constant 0 : index
    %c0_22 = arith.constant 0 : index
    %55 = vector.load %arg8[%c0_21, %c0_22] : memref<128x128xbf16, #tpu.memory_space<vmem>>, vector<128x128xbf16>
    %cst_23 = arith.constant dense<0.000000e+00> : vector<8x128xf32>
    %56 = tpu.matmul %54, %55, %cst_23 {dimension_numbers = #tpu.dot_dimension_numbers<[1], [0], [0], [1], [0, 0, 1, 1], [], []>} : vector<8x128xbf16>, vector<128x128xbf16>, vector<8x128xf32> -> vector<8x128xf32>
    %c0_24 = arith.constant 0 : index
    %c0_25 = arith.constant 0 : index
    %57 = vector.load %arg9[%c0_24, %c0_25] : memref<1x128xf32, #tpu.memory_space<vmem>>, vector<1x128xf32>
    %58 = vector.broadcast %57 : vector<1x128xf32> to vector<8x128xf32>
    %59 = arith.addf %56, %58 : vector<8x128xf32>
    %c0_26 = arith.constant 0 : index
    %c0_27 = arith.constant 0 : index
    %60 = vector.load %arg10[%c0_26, %c0_27] : memref<8x128xf32, #tpu.memory_space<vmem>>, vector<8x128xf32>
    tpu.vector_store %arg10[%c0_26, %c0_27], %59 {strides = array<i32>} : memref<8x128xf32, #tpu.memory_space<vmem>>, vector<8x128xf32>,
    return
  }
}

</mosaic_0001>

<bundles_post_ra>
// kernel: fused_forward.1
= control target key start
LH: loop header
LB: loop body
LE: loop exit
PB: predicated region body
PF: predicated region fallthrough
CT: control target
= control target key end

     0   :  { %vm5530_vm0 = vmmov 0   ;;  %s6942_s1 = inlined_call_operand.vmem [shape: bf16[128,128], index: 1, kind: input, shape index: {}]   ;;  %s6943_s0 = inlined_call_operand.vmem [shape: bf16[128,128], index: 0, kind: input, shape index: {}]   ;;  %s6944_s3 = inlined_call_operand.vmem [shape: bf16[1152,128], index: 3, kind: input, shape index: {}]   ;;  %s6945_s2 = inlined_call_operand.vmem [shape: f32[1,128], index: 2, kind: input, shape index: {}]   ;;  %s6946_s4 = inlined_call_operand.vmem [shape: bf16[1152,128], index: 4, kind: input, shape index: {}]   ;;  %s6947_s6 = inlined_call_operand.vmem [shape: bf16[2048,128], index: 6, kind: input, shape index: {}]   ;;  %s6948_s5 = inlined_call_operand.vmem [shape: f32[1,128], index: 5, kind: input, shape index: {}]   ;;  %s6949_s8 = inlined_call_operand.vmem [shape: bf16[128,128], index: 8, kind: input, shape index: {}]   ;;  %s6950_s7 = inlined_call_operand.vmem [shape: f32[1,128], index: 7, kind: input, shape index: {}]   ;;  %s6951_s9 = inlined_call_operand.vmem [shape: f32[1,128], index: 9, kind: input, shape index: {}]   ;;  %s6952_s10 = inlined_call_operand.vmem [shape: f32[8,128], index: 10, kind: output, shape index: {}]  }
   0x1   :  { %v5233_v0 = vld [vmem:[%s6942_s1] sm:$0xff]   ;;  %v5234_v1 = vld [vmem:[%s6942_s1 + $0x8] sm:$0xff]   ;;  %v5235_v2 = vld [vmem:[%s6942_s1 + $0x10] sm:$0xff]  }
   0x2   :  { %4987 = vmatprep.subr.bf16.mxu0 %v5233_v0  ;;  %v5236_v3 = vld [vmem:[%s6942_s1 + $0x18] sm:$0xff]   ;;  %v5241_v4 = vld [vmem:[%s6943_s0] sm:$0xff]   ;;  %v5238_v6 = vld [vmem:[%s6942_s1 + $0x28] sm:$0xff]  }
   0x3   :  { %4988 = vmatpush3.bf16.msra.mxu0 %v5233_v0  ;;  %5003 = vmatprep.mubr.bf16.mxu0 %v5241_v4  ;;  %v5237_v5 = vld [vmem:[%s6942_s1 + $0x20] sm:$0xff]   ;;  %v5239_v7 = vld [vmem:[%s6942_s1 + $0x30] sm:$0xff]   ;;  %v5240_v8 = vld [vmem:[%s6942_s1 + $0x38] sm:$0xff]  }
   0x4   :  { %4989 = vmatprep.subr.bf16.mxu0 %v5234_v1  ;;  %v5242_v9 = vld [vmem:[%s6943_s0 + $0x8] sm:$0xff]   ;;  %v5243_v10 = vld [vmem:[%s6943_s0 + $0x10] sm:$0xff]   ;;  %v5244_v11 = vld [vmem:[%s6943_s0 + $0x18] sm:$0xff]  }
   0x5   :  { %v5245_v12 = vld [vmem:[%s6943_s0 + $0x20] sm:$0xff]   ;;  %v5246_v13 = vld [vmem:[%s6943_s0 + $0x28] sm:$0xff]   ;;  %v5247_v14 = vld [vmem:[%s6943_s0 + $0x30] sm:$0xff]  }
   0x6   :  { %v5248_v15 = vld [vmem:[%s6943_s0 + $0x38] sm:$0xff]   ;;  %v5249_v16 = vld [vmem:[%s6944_s3] sm:$0xff]  }
   0x7   :  { %4990 = vmatpush3.bf16.msra.mxu0 %v5234_v1  ;;  %5035 = vmatprep.mubr.bf16.mxu1 %v5249_v16  ;;  %v4134_v17 = vld [vmem:[%s6945_s2] ss:$0 sm:$0xff]  ;;  %v5256_v16 = vld [vmem:[%s6944_s3 + $0x38] sm:$0xff]  }
   0x8   :  { %4991 = vmatprep.subr.bf16.mxu0 %v5235_v2 }
   0xb   :  { %4992 = vmatpush3.bf16.msra.mxu0 %v5235_v2 }
   0xc   :  { %4993 = vmatprep.subr.bf16.mxu0 %v5236_v3 }
   0xf   :  { %4994 = vmatpush3.bf16.msra.mxu0 %v5236_v3 }
  0x10   :  { %4995 = vmatprep.subr.bf16.mxu0 %v5237_v5 }
  0x13   :  { %4996 = vmatpush3.bf16.msra.mxu0 %v5237_v5 }
  0x14   :  { %4997 = vmatprep.subr.bf16.mxu0 %v5238_v6 }
  0x17   :  { %4998 = vmatpush3.bf16.msra.mxu0 %v5238_v6 }
  0x18   :  { %4999 = vmatprep.subr.bf16.mxu0 %v5239_v7 }
  0x1b   :  { %5000 = vmatpush3.bf16.msra.mxu0 %v5239_v7 }
  0x1c   :  { %5001 = vmatprep.subr.bf16.mxu0 %v5240_v8 }
  0x1f   :  { %5002 = vmatpush3.bf16.msra.mxu0 %v5240_v8 }
  0x22   :  { %5004 = vmatmul.mubr.bf16.vlgmr.msra.gmra.mrb[0].mxu0 %v5242_v9 }
  0x23   :  { %5007 = vmatprep.mubr.bf16.mxu0 %v5243_v10  ;;  %v5250_v10 = vld [vmem:[%s6944_s3 + $0x8] sm:$0xff]  }
  0x2a   :  { %5008 = vmatmul.mubr.bf16.gmra.mrb[4].mxu0 %v5244_v11  ;;  %v5251_v11 = vld [vmem:[%s6944_s3 + $0x10] sm:$0xff]  }
  0x2b   :  { %5011 = vmatprep.mubr.bf16.mxu0 %v5245_v12  ;;  %v5252_v12 = vld [vmem:[%s6944_s3 + $0x18] sm:$0xff]  }
  0x32   :  { %5012 = vmatmul.mubr.bf16.gmra.mrb[8].mxu0 %v5246_v13  ;;  %v5253_v13 = vld [vmem:[%s6944_s3 + $0x20] sm:$0xff]  }
  0x33   :  { %5015 = vmatprep.mubr.bf16.mxu0 %v5247_v14  ;;  %v5254_v14 = vld [vmem:[%s6944_s3 + $0x28] sm:$0xff]  }
  0x3a   :  { %5016 = vmatmul.mubr.bf16.gmra.mrb[12].mxu0 %v5248_v15  ;;  %v5255_v15 = vld [vmem:[%s6944_s3 + $0x30] sm:$0xff]  }
  0xf5   :  { %v5005_v18 = vpop.f32.mrb[0].mxu0 }
  0xf6   :  { %v214_v19 = vadd.f32 %v5005_v18, %v4134_v17  ;;  %v205_v20 = vpop.f32.mrb[1].mxu0  ;;  %v5258_v18 = vld [vmem:[%s6944_s3 + $0x48] sm:$0xff]  }
  0xf7   :  { %v206_v21 = vadd.f32 %v4134_v17, %v205_v20  ;;  %v5006_v22 = vpop.f32.mrb[2].mxu0  ;;  %v5260_v20 = vld [vmem:[%s6944_s3 + $0x58] sm:$0xff]  }
  0xf8   :  { %v217_v23 = vadd.f32 %v5006_v22, %v4134_v17  ;;  %v208_v24 = vpop.f32.mrb[3].mxu0  ;;  %v270_v26 = vmax.f32 %v214_v19, 0.0  ;;  %v5259_v19 = vld [vmem:[%s6944_s3 + $0x50] sm:$0xff]   ;;  %v5262_v22 = vld [vmem:[%s6944_s3 + $0x68] sm:$0xff]  }
  0xf9   :  { %v209_v25 = vadd.f32 %v4134_v17, %v208_v24  ;;  %v268_v28 = vmax.f32 %v206_v21, 0.0  ;;  %v5261_v21 = vld [vmem:[%s6944_s3 + $0x60] sm:$0xff]   ;;  %v5264_v24 = vld [vmem:[%s6944_s3 + $0x78] sm:$0xff]  }
  0xfa   :  { %v271_v27 = vmax.f32 %v217_v23, 0.0  ;;  %v5263_v23 = vld [vmem:[%s6944_s3 + $0x70] sm:$0xff]  }
  0xfb   :  { %v269_v29 = vmax.f32 %v209_v25, 0.0  ;;  %v5265_v25 = vld [vmem:[%s6944_s3 + $0x80] sm:$0xff]  }
  0xfc   :  { %v285_v30 = vpack.c.bf16 %v271_v27, %v270_v26  ;;  %v5266_v26 = vld [vmem:[%s6944_s3 + $0x88] sm:$0xff]   ;;  %v5267_v27 = vld [vmem:[%s6944_s3 + $0x90] sm:$0xff]  }
  0xfd   :  { %v5009_v31 = vpop.f32.mrb[4].mxu0  ;;  %v284_v32 = vpack.c.bf16 %v269_v29, %v268_v28  ;;  %v5268_v28 = vld [vmem:[%s6944_s3 + $0x98] sm:$0xff]   ;;  %v5269_v29 = vld [vmem:[%s6944_s3 + $0xa0] sm:$0xff]  }
  0xfe   :  { %v230_v33 = vadd.f32 %v5009_v31, %v4134_v17  ;;  %v221_v34 = vpop.f32.mrb[5].mxu0  ;;  %v5271_v31 = vld [vmem:[%s6944_s3 + $0xb0] sm:$0xff]  }
  0xff   :  { %v222_v35 = vadd.f32 %v4134_v17, %v221_v34  ;;  %v5010_v36 = vpop.f32.mrb[6].mxu0  ;;  %5019 = vmatprep.subr.bf16.mxu1 %v284_v32  ;;  %v5305_v34 = vld [vmem:[%s6946_s4 + $0x40] sm:$0xff]  }
 0x100   :  { %v233_v37 = vadd.f32 %v5010_v36, %v4134_v17  ;;  %v224_v38 = vpop.f32.mrb[7].mxu0  ;;  %5020 = vmatpush3.bf16.msra.mxu1 %v284_v32  ;;  %v274_v40 = vmax.f32 %v230_v33, 0.0  ;;  %v5272_v32 = vld [vmem:[%s6944_s3 + $0xb8] sm:$0xff]   ;;  %v5273_v33 = vld [vmem:[%s6944_s3 + $0xc0] sm:$0xff]   ;;  %v5274_v36 = vld [vmem:[%s6944_s3 + $0xc8] sm:$0xff]   ;;  %4530 = vmatprep.subr.bf16.mxu0 %v5305_v34 }
 0x101   :  { %v225_v39 = vadd.f32 %v4134_v17, %v224_v38  ;;  %5021 = vmatprep.subr.bf16.mxu1 %v285_v30  ;;  %v272_v42 = vmax.f32 %v222_v35, 0.0  ;;  %v5306_v35 = vld [vmem:[%s6946_s4] sm:$0xff]   ;;  %v5275_v38 = vld [vmem:[%s6944_s3 + $0xd0] sm:$0xff]  }
 0x102   :  { %v275_v41 = vmax.f32 %v233_v37, 0.0  ;;  %4531 = vmatpush3.bf16.msra.mxu0 %v5306_v35  ;;  %v5307_v37 = vld [vmem:[%s6946_s4 + $0x48] sm:$0xff]   ;;  %v5318_v35 = vld [vmem:[%s6944_s3 + $0x1d8] sm:$0xff]  }
 0x103   :  { %v273_v43 = vmax.f32 %v225_v39, 0.0  ;;  %v5308_v39 = vld [vmem:[%s6946_s4 + $0x8] sm:$0xff]   ;;  %4532 = vmatprep.subr.bf16.mxu0 %v5307_v37  ;;  %v5327_v37 = vld [vmem:[%s6944_s3 + $0x1e0] sm:$0xff]  }
 0x104   :  { %v287_v44 = vpack.c.bf16 %v275_v41, %v274_v40  ;;  %5022 = vmatpush3.bf16.msra.mxu1 %v285_v30  ;;  %v5270_v30 = vld [vmem:[%s6944_s3 + $0xa8] sm:$0xff]   ;;  %v5311_v40 = vld [vmem:[%s6946_s4 + $0x50] sm:$0xff]  }
 0x105   :  { %v286_v45 = vpack.c.bf16 %v273_v43, %v272_v42  ;;  %v5013_v46 = vpop.f32.mrb[8].mxu0  ;;  %v5312_v41 = vld [vmem:[%s6946_s4 + $0x10] sm:$0xff]   ;;  %v5276_v42 = vld [vmem:[%s6944_s3 + $0xd8] sm:$0xff]   ;;  %v5277_v43 = vld [vmem:[%s6944_s3 + $0xe0] sm:$0xff]  }
 0x106   :  { %v246_v47 = vadd.f32 %v5013_v46, %v4134_v17  ;;  %v237_v48 = vpop.f32.mrb[9].mxu0  ;;  %4533 = vmatpush3.bf16.msra.mxu0 %v5308_v39  ;;  %v5315_v46 = vld [vmem:[%s6946_s4 + $0x60] sm:$0xff]  }
 0x107   :  { %v238_v49 = vadd.f32 %v4134_v17, %v237_v48  ;;  %v5014_v50 = vpop.f32.mrb[10].mxu0  ;;  %5023 = vmatprep.subr.bf16.mxu1 %v286_v45  ;;  %4534 = vmatprep.subr.bf16.mxu0 %v5311_v40  ;;  %v5278_v48 = vld [vmem:[%s6944_s3 + $0xe8] sm:$0xff]  }
 0x108   :  { %v249_v51 = vadd.f32 %v5014_v50, %v4134_v17  ;;  %v240_v52 = vpop.f32.mrb[11].mxu0  ;;  %5024 = vmatpush3.bf16.msra.mxu1 %v286_v45  ;;  %v278_v54 = vmax.f32 %v246_v47, 0.0  ;;  %v5314_v45 = vld [vmem:[%s6946_s4 + $0x18] sm:$0xff]   ;;  %v5316_v47 = vld [vmem:[%s6946_s4 + $0x20] sm:$0xff]   ;;  %v5319_v50 = vld [vmem:[%s6946_s4 + $0x68] sm:$0xff]  }
 0x109   :  { %v241_v53 = vadd.f32 %v4134_v17, %v240_v52  ;;  %5025 = vmatprep.subr.bf16.mxu1 %v287_v44  ;;  %v276_v56 = vmax.f32 %v238_v49, 0.0  ;;  %v5279_v49 = vld [vmem:[%s6944_s3 + $0xf0] sm:$0xff]  }
 0x10a   :  { %v279_v55 = vmax.f32 %v249_v51, 0.0  ;;  %4535 = vmatpush3.bf16.msra.mxu0 %v5312_v41  ;;  %v5320_v51 = vld [vmem:[%s6946_s4 + $0x28] sm:$0xff]   ;;  %v5321_v52 = vld [vmem:[%s6946_s4 + $0x70] sm:$0xff]  }
 0x10b   :  { %v277_v57 = vmax.f32 %v241_v53, 0.0  ;;  %v5322_v53 = vld [vmem:[%s6946_s4 + $0x30] sm:$0xff]  }
 0x10c   :  { %v289_v58 = vpack.c.bf16 %v279_v55, %v278_v54  ;;  %5026 = vmatpush3.bf16.msra.mxu1 %v287_v44  ;;  %v5313_v44 = vld [vmem:[%s6946_s4 + $0x58] sm:$0xff]   ;;  %v5281_v55 = vld [vmem:[%s6944_s3 + $0x100] sm:$0xff]  }
 0x10d   :  { %v288_v59 = vpack.c.bf16 %v277_v57, %v276_v56  ;;  %v5017_v60 = vpop.f32.mrb[12].mxu0  ;;  %4536 = vmatprep.subr.bf16.mxu0 %v5313_v44  ;;  %v5280_v54 = vld [vmem:[%s6944_s3 + $0xf8] sm:$0xff]  }
 0x10e   :  { %v262_v61 = vadd.f32 %v5017_v60, %v4134_v17  ;;  %v253_v62 = vpop.f32.mrb[13].mxu0  ;;  %4537 = vmatpush3.bf16.msra.mxu0 %v5314_v45  ;;  %v5323_v56 = vld [vmem:[%s6946_s4 + $0x78] sm:$0xff]   ;;  %v5283_v60 = vld [vmem:[%s6944_s3 + $0x110] sm:$0xff]  }
 0x10f   :  { %v254_v63 = vadd.f32 %v4134_v17, %v253_v62  ;;  %v5018_v0 = vpop.f32.mrb[14].mxu0  ;;  %5027 = vmatprep.subr.bf16.mxu1 %v288_v59  ;;  %4538 = vmatprep.subr.bf16.mxu0 %v5315_v46  ;;  %v5324_v57 = vld [vmem:[%s6946_s4 + $0x38] sm:$0xff]   ;;  %v5285_v62 = vld [vmem:[%s6944_s3 + $0x120] sm:$0xff]   ;;  %v5333_v45 = vld [vmem:[%s6944_s3 + $0x1f0] sm:$0xff]  }
 0x110   :  { %v265_v1 = vadd.f32 %v5018_v0, %v4134_v17  ;;  %v256_v2 = vpop.f32.mrb[15].mxu0  ;;  %5028 = vmatpush3.bf16.msra.mxu1 %v288_v59  ;;  %v282_v4 = vmax.f32 %v262_v61, 0.0  ;;  %v5282_v59 = vld [vmem:[%s6944_s3 + $0x108] sm:$0xff]   ;;  %v5284_v61 = vld [vmem:[%s6944_s3 + $0x118] sm:$0xff]   ;;  %v5287_v0 = vld [vmem:[%s6944_s3 + $0x130] sm:$0xff]  }
 0x111   :  { %v257_v3 = vadd.f32 %v4134_v17, %v256_v2  ;;  %5029 = vmatprep.subr.bf16.mxu1 %v289_v58  ;;  %v280_v6 = vmax.f32 %v254_v63, 0.0  ;;  %v5257_v17 = vld [vmem:[%s6944_s3 + $0x40] sm:$0xff]   ;;  %v5286_v63 = vld [vmem:[%s6944_s3 + $0x128] sm:$0xff]  }
 0x112   :  { %v283_v5 = vmax.f32 %v265_v1, 0.0  ;;  %4539 = vmatpush3.bf16.msra.mxu0 %v5316_v47  ;;  %v5288_v1 = vld [vmem:[%s6944_s3 + $0x138] sm:$0xff]   ;;  %v5289_v2 = vld [vmem:[%s6944_s3 + $0x140] sm:$0xff]  }
 0x113   :  { %v281_v7 = vmax.f32 %v257_v3, 0.0  ;;  %4540 = vmatprep.subr.bf16.mxu0 %v5319_v50  ;;  %v5290_v3 = vld [vmem:[%s6944_s3 + $0x148] sm:$0xff]  }
 0x114   :  { %v291_v8 = vpack.c.bf16 %v283_v5, %v282_v4  ;;  %5030 = vmatpush3.bf16.msra.mxu1 %v289_v58  ;;  %v5325_v58 = vld [vmem:[%s6946_s4 + $0xc0] sm:$0xff]   ;;  %v5291_v4 = vld [vmem:[%s6944_s3 + $0x150] sm:$0xff]   ;;  %v5292_v5 = vld [vmem:[%s6944_s3 + $0x158] sm:$0xff]  }
 0x115   :  { %v290_v9 = vpack.c.bf16 %v281_v7, %v280_v6  ;;  %v5293_v6 = vld [vmem:[%s6944_s3 + $0x160] sm:$0xff]   ;;  %v5294_v7 = vld [vmem:[%s6944_s3 + $0x168] sm:$0xff]  }
 0x116   :  { %4541 = vmatpush3.bf16.msra.mxu0 %v5320_v51  ;;  %v5334_v51 = vld [vmem:[%s6944_s3 + $0x1f8] sm:$0xff]  }
 0x117   :  { %5031 = vmatprep.subr.bf16.mxu1 %v290_v9  ;;  %4542 = vmatprep.subr.bf16.mxu0 %v5321_v52 }
 0x118   :  { %5032 = vmatpush3.bf16.msra.mxu1 %v290_v9  ;;  %v5296_v9 = vld [vmem:[%s6944_s3 + $0x178] sm:$0xff]  }
 0x119   :  { %5033 = vmatprep.subr.bf16.mxu1 %v291_v8 }
 0x11a   :  { %4543 = vmatpush3.bf16.msra.mxu0 %v5322_v53  ;;  %v5339_v53 = vld [vmem:[%s6944_s3 + $0x200] sm:$0xff]  }
 0x11b   :  { %4544 = vmatprep.subr.bf16.mxu0 %v5323_v56 }
 0x11c   :  { %5034 = vmatpush3.bf16.msra.mxu1 %v291_v8  ;;  %v5295_v8 = vld [vmem:[%s6944_s3 + $0x170] sm:$0xff]  }
 0x11e   :  { %4545 = vmatpush3.bf16.msra.mxu0 %v5324_v57  ;;  %v5326_v57 = vld [vmem:[%s6946_s4 + $0x80] sm:$0xff]  }
 0x11f   :  { %5036 = vmatmul.mubr.bf16.vlgmr.msra.gmra.mrb[0].mxu1 %v5250_v10  ;;  %4594 = vmatprep.subr.bf16.mxu0 %v5325_v58  ;;  %v5297_v10 = vld [vmem:[%s6944_s3 + $0x180] sm:$0xff]   ;;  %v5329_v58 = vld [vmem:[%s6946_s4 + $0xc8] sm:$0xff]  }
 0x120   :  { %5039 = vmatprep.mubr.bf16.mxu1 %v5251_v11  ;;  %v5298_v11 = vld [vmem:[%s6944_s3 + $0x188] sm:$0xff]  }
 0x127   :  { %5040 = vmatmul.mubr.bf16.gmra.mrb[4].mxu1 %v5252_v12  ;;  %v5299_v12 = vld [vmem:[%s6944_s3 + $0x190] sm:$0xff]  }
 0x128   :  { %5043 = vmatprep.mubr.bf16.mxu1 %v5253_v13  ;;  %v5300_v13 = vld [vmem:[%s6944_s3 + $0x198] sm:$0xff]  }
 0x12f   :  { %5044 = vmatmul.mubr.bf16.gmra.mrb[8].mxu1 %v5254_v14  ;;  %v5301_v14 = vld [vmem:[%s6944_s3 + $0x1a0] sm:$0xff]  }
 0x130   :  { %5047 = vmatprep.mubr.bf16.mxu1 %v5255_v15  ;;  %v5302_v15 = vld [vmem:[%s6944_s3 + $0x1a8] sm:$0xff]  }
 0x137   :  { %5048 = vmatmul.mubr.bf16.gmra.mrb[12].mxu1 %v5256_v16  ;;  %v5303_v16 = vld [vmem:[%s6944_s3 + $0x1b0] sm:$0xff]  }
 0x138   :  { %5051 = vmatprep.mubr.bf16.mxu1 %v5257_v17 }
 0x13f   :  { %5052 = vmatmul.mubr.bf16.gmra.mrb[16].mxu1 %v5258_v18 }
 0x140   :  { %5055 = vmatprep.mubr.bf16.mxu1 %v5259_v19  ;;  %v5304_v19 = vld [vmem:[%s6944_s3 + $0x1b8] sm:$0xff]  }
 0x147   :  { %5056 = vmatmul.mubr.bf16.gmra.mrb[20].mxu1 %v5260_v20 }
 0x148   :  { %5059 = vmatprep.mubr.bf16.mxu1 %v5261_v21  ;;  %v5309_v21 = vld [vmem:[%s6944_s3 + $0x1c0] sm:$0xff]  }
 0x14f   :  { %5060 = vmatmul.mubr.bf16.gmra.mrb[24].mxu1 %v5262_v22 }
 0x150   :  { %5063 = vmatprep.mubr.bf16.mxu1 %v5263_v23 }
 0x157   :  { %5064 = vmatmul.mubr.bf16.gmra.mrb[28].mxu1 %v5264_v24 }
 0x158   :  { %5067 = vmatprep.mubr.bf16.mxu1 %v5265_v25 }
 0x15f   :  { %5068 = vmatmul.mubr.bf16.gmra.mrb[32].mxu1 %v5266_v26 }
 0x160   :  { %5071 = vmatprep.mubr.bf16.mxu1 %v5267_v27  ;;  %v5310_v27 = vld [vmem:[%s6944_s3 + $0x1c8] sm:$0xff]  }
 0x167   :  { %5072 = vmatmul.mubr.bf16.gmra.mrb[36].mxu1 %v5268_v28 }
 0x168   :  { %5075 = vmatprep.mubr.bf16.mxu1 %v5269_v29  ;;  %v5317_v29 = vld [vmem:[%s6944_s3 + $0x1d0] sm:$0xff]  }
 0x16f   :  { %5076 = vmatmul.mubr.bf16.gmra.mrb[40].mxu1 %v5270_v30 }
 0x170   :  { %5079 = vmatprep.mubr.bf16.mxu1 %v5271_v31 }
 0x177   :  { %5080 = vmatmul.mubr.bf16.gmra.mrb[44].mxu1 %v5272_v32 }
 0x178   :  { %5083 = vmatprep.mubr.bf16.mxu1 %v5273_v33 }
 0x17f   :  { %5084 = vmatmul.mubr.bf16.gmra.mrb[48].mxu1 %v5274_v36 }
 0x180   :  { %5087 = vmatprep.mubr.bf16.mxu1 %v5275_v38 }
 0x187   :  { %5088 = vmatmul.mubr.bf16.gmra.mrb[52].mxu1 %v5276_v42 }
 0x188   :  { %5091 = vmatprep.mubr.bf16.mxu1 %v5277_v43  ;;  %v5328_v43 = vld [vmem:[%s6944_s3 + $0x1e8] sm:$0xff]  }
 0x18f   :  { %5092 = vmatmul.mubr.bf16.gmra.mrb[56].mxu1 %v5278_v48 }
 0x190   :  { %5095 = vmatprep.mubr.bf16.mxu1 %v5279_v49 }
 0x197   :  { %5096 = vmatmul.mubr.bf16.gmra.mrb[60].mxu1 %v5280_v54 }
 0x198   :  { %5099 = vmatprep.mubr.bf16.mxu1 %v5281_v55 }
 0x19f   :  { %5100 = vmatmul.mubr.bf16.gmra.mrb[64].mxu1 %v5282_v59 }
 0x1a0   :  { %5103 = vmatprep.mubr.bf16.mxu1 %v5283_v60  ;;  %v5330_v60 = vld [vmem:[%s6946_s4 + $0x88] sm:$0xff]  }
 0x1a7   :  { %5104 = vmatmul.mubr.bf16.gmra.mrb[68].mxu1 %v5284_v61 }
 0x1a8   :  { %5107 = vmatprep.mubr.bf16.mxu1 %v5285_v62  ;;  %v5331_v62 = vld [vmem:[%s6946_s4 + $0xd0] sm:$0xff]  }
 0x1af   :  { %5108 = vmatmul.mubr.bf16.gmra.mrb[72].mxu1 %v5286_v63  ;;  %v5340_v63 = vld [vmem:[%s6944_s3 + $0x208] sm:$0xff]  }
 0x1b0   :  { %5111 = vmatprep.mubr.bf16.mxu1 %v5287_v0 }
 0x1b7   :  { %5112 = vmatmul.mubr.bf16.gmra.mrb[76].mxu1 %v5288_v1  ;;  %v5343_v1 = vld [vmem:[%s6944_s3 + $0x210] sm:$0xff]  }
 0x1b8   :  { %5115 = vmatprep.mubr.bf16.mxu1 %v5289_v2 }
 0x1bf   :  { %5116 = vmatmul.mubr.bf16.gmra.mrb[80].mxu1 %v5290_v3 }
 0x1c0   :  { %5119 = vmatprep.mubr.bf16.mxu1 %v5291_v4 }
 0x1c7   :  { %5120 = vmatmul.mubr.bf16.gmra.mrb[84].mxu1 %v5292_v5  ;;  %v5332_v5 = vld [vmem:[%s6946_s4 + $0x90] sm:$0xff]  }
 0x1c8   :  { %5123 = vmatprep.mubr.bf16.mxu1 %v5293_v6  ;;  %v5335_v6 = vld [vmem:[%s6946_s4 + $0xd8] sm:$0xff]  }
 0x1cf   :  { %5124 = vmatmul.mubr.bf16.gmra.mrb[88].mxu1 %v5294_v7 }
 0x1d0   :  { %5127 = vmatprep.mubr.bf16.mxu1 %v5295_v8  ;;  %v5336_v8 = vld [vmem:[%s6946_s4 + $0x98] sm:$0xff]  }
 0x1d7   :  { %5128 = vmatmul.mubr.bf16.gmra.mrb[92].mxu1 %v5296_v9 }
 0x1d8   :  { %5131 = vmatprep.mubr.bf16.mxu1 %v5297_v10  ;;  %v5337_v10 = vld [vmem:[%s6946_s4 + $0xe0] sm:$0xff]  }
 0x1df   :  { %5132 = vmatmul.mubr.bf16.gmra.mrb[96].mxu1 %v5298_v11  ;;  %v5344_v11 = vld [vmem:[%s6944_s3 + $0x218] sm:$0xff]  }
 0x1e0   :  { %5135 = vmatprep.mubr.bf16.mxu1 %v5299_v12 }
 0x1e7   :  { %5136 = vmatmul.mubr.bf16.gmra.mrb[100].mxu1 %v5300_v13  ;;  %v5347_v13 = vld [vmem:[%s6944_s3 + $0x220] sm:$0xff]  }
 0x1e8   :  { %5139 = vmatprep.mubr.bf16.mxu1 %v5301_v14 }
 0x1ef   :  { %5140 = vmatmul.mubr.bf16.gmra.mrb[104].mxu1 %v5302_v15 }
 0x1f0   :  { %5143 = vmatprep.mubr.bf16.mxu1 %v5303_v16 }
 0x1f2   :  { %v5853_v17 = vpop.f32.mrb[0].mxu1 }
 0x1f3   :  { %v902_v18 = vpop.f32.mrb[1].mxu1 }
 0x1f4   :  { %v5858_v20 = vpop.f32.mrb[2].mxu1 }
 0x1f5   :  { %v1478_v22 = vpack.c.bf16 %v5858_v20, %v5853_v17  ;;  %v905_v23 = vpop.f32.mrb[3].mxu1  ;;  %v5338_v17 = vld [vmem:[%s6946_s4 + $0xa0] sm:$0xff]   ;;  %v5342_v20 = vld [vmem:[%s6946_s4 + $0xa8] sm:$0xff]  }
 0x1f6   :  { %v1477_v24 = vpack.c.bf16 %v905_v23, %v902_v18  ;;  %v5341_v18 = vld [vmem:[%s6946_s4 + $0xe8] sm:$0xff]  }
 0x1f7   :  { %5144 = vmatmul.mubr.bf16.gmra.mrb[108].mxu1 %v5304_v19  ;;  %v5348_v23 = vld [vmem:[%s6944_s3 + $0x228] sm:$0xff]  }
 0x1f8   :  { %5147 = vmatprep.mubr.bf16.mxu1 %v5309_v21 }
 0x1fa   :  { %v5865_v25 = vpop.f32.mrb[4].mxu1 }
 0x1fb   :  { %v5867_v26 = vpop.f32.mrb[5].mxu1 }
 0x1fc   :  { %v5872_v28 = vpop.f32.mrb[6].mxu1 }
 0x1fd   :  { %v1480_v30 = vpack.c.bf16 %v5872_v28, %v5865_v25  ;;  %v5879_v31 = vpop.f32.mrb[7].mxu1 }
 0x1fe   :  { %v1479_v32 = vpack.c.bf16 %v5879_v31, %v5867_v26  ;;  %v5351_v26 = vld [vmem:[%s6944_s3 + $0x230] sm:$0xff]  }
 0x1ff   :  { %5148 = vmatmul.mubr.bf16.gmra.mrb[112].mxu1 %v5310_v27 }
 0x200   :  { %5151 = vmatprep.mubr.bf16.mxu1 %v5317_v29 }
 0x202   :  { %v5883_v33 = vpop.f32.mrb[8].mxu1 }
 0x203   :  { %v5885_v34 = vpop.f32.mrb[9].mxu1 }
 0x204   :  { %v5890_v36 = vpop.f32.mrb[10].mxu1 }
 0x205   :  { %v1482_v38 = vpack.c.bf16 %v5890_v36, %v5883_v33  ;;  %v5897_v39 = vpop.f32.mrb[11].mxu1 }
 0x206   :  { %v1481_v40 = vpack.c.bf16 %v5897_v39, %v5885_v34 }
 0x207   :  { %5152 = vmatmul.mubr.bf16.gmra.mrb[116].mxu1 %v5318_v35  ;;  %v5349_v35 = vld [vmem:[%s6946_s4 + $0xf8] sm:$0xff]  }
 0x208   :  { %5155 = vmatprep.mubr.bf16.mxu1 %v5327_v37 }
 0x20a   :  { %v5901_v41 = vpop.f32.mrb[12].mxu1 }
 0x20b   :  { %v5903_v42 = vpop.f32.mrb[13].mxu1 }
 0x20c   :  { %v5908_v44 = vpop.f32.mrb[14].mxu1 }
 0x20d   :  { %v1484_v46 = vpack.c.bf16 %v5908_v44, %v5901_v41  ;;  %v5915_v47 = vpop.f32.mrb[15].mxu1  ;;  %v5356_v41 = vld [vmem:[%s6946_s4 + $0x108] sm:$0xff]   ;;  %v5386_v44 = vld [vmem:[%s6947_s6 + $0x40] sm:$0xff]  }
 0x20e   :  { %v1483_v48 = vpack.c.bf16 %v5915_v47, %v5903_v42  ;;  %4802 = vmatprep.subr.bf16.mxu1 %v5386_v44 }
 0x20f   :  { %5156 = vmatmul.mubr.bf16.gmra.mrb[120].mxu1 %v5328_v43  ;;  %v5350_v43 = vld [vmem:[%s6946_s4 + $0xb8] sm:$0xff]  }
 0x210   :  { %5159 = vmatprep.mubr.bf16.mxu1 %v5333_v45 }
 0x212   :  { %v5053_v49 = vpop.f32.mrb[16].mxu1 }
 0x213   :  { %v966_v50 = vpop.f32.mrb[17].mxu1 }
 0x214   :  { %v5054_v52 = vpop.f32.mrb[18].mxu1 }
 0x215   :  { %v1486_v54 = vpack.c.bf16 %v5054_v52, %v5053_v49  ;;  %v969_v55 = vpop.f32.mrb[19].mxu1  ;;  %v5352_v49 = vld [vmem:[%s6944_s3 + $0x238] sm:$0xff]  }
 0x216   :  { %v1485_v56 = vpack.c.bf16 %v969_v55, %v966_v50  ;;  %v5353_v50 = vld [vmem:[%s6946_s4 + $0x140] sm:$0xff]  }
 0x217   :  { %5160 = vmatmul.mubr.bf16.gmra.mrb[124].mxu1 %v5334_v51 }
 0x218   :  { %2164 = vmatprep.mubr.bf16.mxu0 %v1485_v56  ;;  %5163 = vmatprep.mubr.bf16.mxu1 %v5339_v53 }
 0x219   :  { %2165 = vmatmul.mubr.bf16.vlgmr.msra.gmra.mrb[16].mxu0 %v1477_v24 }
 0x21a   :  { %4595 = vmatpush3.bf16.msra.mxu0 %v5326_v57  ;;  %v5057_v59 = vpop.f32.mrb[20].mxu1  ;;  %2172 = vmatprep.mubr.bf16.mxu0 %v1486_v54 }
 0x21b   :  { %v982_v61 = vpop.f32.mrb[21].mxu1  ;;  %4596 = vmatprep.subr.bf16.mxu0 %v5329_v58 }
 0x21c   :  { %v5058_v0 = vpop.f32.mrb[22].mxu1 }
 0x21d   :  { %v1488_v2 = vpack.c.bf16 %v5058_v0, %v5057_v59  ;;  %v985_v3 = vpop.f32.mrb[23].mxu1 }
 0x21e   :  { %v1487_v4 = vpack.c.bf16 %v985_v3, %v982_v61  ;;  %4597 = vmatpush3.bf16.msra.mxu0 %v5330_v60  ;;  %v5354_v3 = vld [vmem:[%s6946_s4 + $0x100] sm:$0xff]  }
 0x21f   :  { %4598 = vmatprep.subr.bf16.mxu0 %v5331_v62  ;;  %5164 = vmatmul.mubr.bf16.gmra.mrb[128].mxu1 %v5340_v63 }
 0x220   :  { %5167 = vmatprep.mubr.bf16.mxu1 %v5343_v1 }
 0x221   :  { %2173 = vmatmul.mubr.bf16.gmra.mrb[20].mxu0 %v1478_v22  ;;  %v5345_v22 = vld [vmem:[%s6946_s4 + $0xf0] sm:$0xff]  }
 0x222   :  { %v5061_v7 = vpop.f32.mrb[24].mxu1  ;;  %2180 = vmatprep.mubr.bf16.mxu0 %v1487_v4  ;;  %4599 = vmatpush3.bf16.msra.mxu0 %v5332_v5  ;;  %v5355_v4 = vld [vmem:[%s6946_s4 + $0x148] sm:$0xff]   ;;  %v5387_v5 = vld [vmem:[%s6947_s6] sm:$0xff]  }
 0x223   :  { %v998_v9 = vpop.f32.mrb[25].mxu1  ;;  %4600 = vmatprep.subr.bf16.mxu0 %v5335_v6  ;;  %4803 = vmatpush3.bf16.msra.mxu1 %v5387_v5 }
 0x224   :  { %v5062_v12 = vpop.f32.mrb[26].mxu1 }
 0x225   :  { %v1490_v14 = vpack.c.bf16 %v5062_v12, %v5061_v7  ;;  %v1001_v15 = vpop.f32.mrb[27].mxu1  ;;  %v5357_v7 = vld [vmem:[%s6946_s4 + $0x150] sm:$0xff]   ;;  %v5359_v12 = vld [vmem:[%s6946_s4 + $0x158] sm:$0xff]  }
 0x226   :  { %v1489_v16 = vpack.c.bf16 %v1001_v15, %v998_v9  ;;  %4601 = vmatpush3.bf16.msra.mxu0 %v5336_v8  ;;  %v5358_v9 = vld [vmem:[%s6946_s4 + $0x110] sm:$0xff]   ;;  %v5360_v15 = vld [vmem:[%s6946_s4 + $0x118] sm:$0xff]  }
 0x227   :  { %4602 = vmatprep.subr.bf16.mxu0 %v5337_v10  ;;  %5168 = vmatmul.mubr.bf16.gmra.mrb[132].mxu1 %v5344_v11 }
 0x228   :  { %5171 = vmatprep.mubr.bf16.mxu1 %v5347_v13 }
 0x229   :  { %2181 = vmatmul.mubr.bf16.gmra.mrb[24].mxu0 %v1479_v32  ;;  %v5346_v32 = vld [vmem:[%s6946_s4 + $0xb0] sm:$0xff]  }
 0x22a   :  { %v5065_v19 = vpop.f32.mrb[28].mxu1  ;;  %2188 = vmatprep.mubr.bf16.mxu0 %v1488_v2  ;;  %4603 = vmatpush3.bf16.msra.mxu0 %v5338_v17  ;;  %v5361_v17 = vld [vmem:[%s6946_s4 + $0x160] sm:$0xff]  }
 0x22b   :  { %v1014_v21 = vpop.f32.mrb[29].mxu1  ;;  %4604 = vmatprep.subr.bf16.mxu0 %v5341_v18 }
 0x22c   :  { %v5066_v24 = vpop.f32.mrb[30].mxu1 }
 0x22d   :  { %v1492_v27 = vpack.c.bf16 %v5066_v24, %v5065_v19  ;;  %v1017_v29 = vpop.f32.mrb[31].mxu1  ;;  %v5362_v19 = vld [vmem:[%s6946_s4 + $0x120] sm:$0xff]  }
 0x22e   :  { %v1491_v31 = vpack.c.bf16 %v1017_v29, %v1014_v21  ;;  %4605 = vmatpush3.bf16.msra.mxu0 %v5342_v20  ;;  %v5365_v29 = vld [vmem:[%s6946_s4 + $0x170] sm:$0xff]  }
 0x22f   :  { %4606 = vmatprep.subr.bf16.mxu0 %v5345_v22  ;;  %5172 = vmatmul.mubr.bf16.gmra.mrb[136].mxu1 %v5348_v23  ;;  %v5363_v22 = vld [vmem:[%s6946_s4 + $0x168] sm:$0xff]  }
 0x230   :  { %5175 = vmatprep.mubr.bf16.mxu1 %v5351_v26  ;;  %v5364_v26 = vld [vmem:[%s6946_s4 + $0x128] sm:$0xff]  }
 0x231   :  { %2189 = vmatmul.mubr.bf16.gmra.mrb[28].mxu0 %v1480_v30 }
 0x232   :  { %v5994_v37 = vpop.f32.mrb[32].mxu1  ;;  %2196 = vmatprep.mubr.bf16.mxu0 %v1489_v16  ;;  %4607 = vmatpush3.bf16.msra.mxu0 %v5346_v32 }
 0x233   :  { %v1030_v45 = vpop.f32.mrb[33].mxu1  ;;  %4608 = vmatprep.subr.bf16.mxu0 %v5349_v35 }
 0x234   :  { %v5070_v25 = vpop.f32.mrb[34].mxu1 }
 0x235   :  { %v1494_v28 = vpack.c.bf16 %v5070_v25, %v5994_v37  ;;  %v1033_v30 = vpop.f32.mrb[35].mxu1  ;;  %v5366_v37 = vld [vmem:[%s6946_s4 + $0x130] sm:$0xff]  }
 0x236   :  { %v1493_v51 = vpack.c.bf16 %v1033_v30, %v1030_v45  ;;  %4609 = vmatpush3.bf16.msra.mxu0 %v5350_v43  ;;  %v5367_v43 = vld [vmem:[%s6946_s4 + $0x178] sm:$0xff]  }
 0x237   :  { %5176 = vmatmul.mubr.bf16.gmra.mrb[140].mxu1 %v5352_v49  ;;  %4658 = vmatprep.subr.bf16.mxu0 %v5353_v50  ;;  %v5368_v50 = vld [vmem:[%s6946_s4 + $0x138] sm:$0xff]  }
 0x239   :  { %2197 = vmatmul.mubr.bf16.gmra.mrb[32].mxu0 %v1481_v40 }
 0x23a   :  { %v6009_v52 = vpop.f32.mrb[36].mxu1  ;;  %2204 = vmatprep.mubr.bf16.mxu0 %v1490_v14 }
 0x23b   :  { %v6011_v53 = vpop.f32.mrb[37].mxu1 }
 0x23c   :  { %v6013_v54 = vpop.f32.mrb[38].mxu1 }
 0x23d   :  { %v1496_v55 = vpack.c.bf16 %v6013_v54, %v6009_v52  ;;  %v6017_v56 = vpop.f32.mrb[39].mxu1 }
 0x23e   :  { %v1495_v57 = vpack.c.bf16 %v6017_v56, %v6011_v53 }
 0x241   :  { %2205 = vmatmul.mubr.bf16.gmra.mrb[36].mxu0 %v1482_v38 }
 0x242   :  { %v6024_v34 = vpop.f32.mrb[40].mxu1  ;;  %2212 = vmatprep.mubr.bf16.mxu0 %v1491_v31 }
 0x243   :  { %v6026_v39 = vpop.f32.mrb[41].mxu1 }
 0x244   :  { %v6028_v40 = vpop.f32.mrb[42].mxu1 }
 0x245   :  { %v1498_v58 = vpack.c.bf16 %v6028_v40, %v6024_v34  ;;  %v6032_v59 = vpop.f32.mrb[43].mxu1 }
 0x246   :  { %v1497_v60 = vpack.c.bf16 %v6032_v59, %v6026_v39  ;;  %v5393_v59 = vld [vmem:[%s6947_s6 + $0x8] sm:$0xff]  }
 0x249   :  { %2213 = vmatmul.mubr.bf16.gmra.mrb[40].mxu0 %v1483_v48 }
 0x24a   :  { %v6039_v33 = vpop.f32.mrb[44].mxu1  ;;  %2220 = vmatprep.mubr.bf16.mxu0 %v1492_v27 }
 0x24b   :  { %v6041_v36 = vpop.f32.mrb[45].mxu1 }
 0x24c   :  { %v6043_v38 = vpop.f32.mrb[46].mxu1 }
 0x24d   :  { %v1500_v61 = vpack.c.bf16 %v6043_v38, %v6039_v33  ;;  %v6047_v62 = vpop.f32.mrb[47].mxu1  ;;  %v5372_v33 = vld [vmem:[%s6946_s4 + $0x188] sm:$0xff]  }
 0x24e   :  { %v1499_v63 = vpack.c.bf16 %v6047_v62, %v6041_v36 }
 0x251   :  { %2221 = vmatmul.mubr.bf16.gmra.mrb[44].mxu0 %v1484_v46 }
 0x252   :  { %v5085_v42 = vpop.f32.mrb[48].mxu1 }
 0x253   :  { %v1094_v47 = vpop.f32.mrb[49].mxu1 }
 0x254   :  { %v5086_v48 = vpop.f32.mrb[50].mxu1 }
 0x255   :  { %v1502_v0 = vpack.c.bf16 %v5086_v48, %v5085_v42  ;;  %v1097_v1 = vpop.f32.mrb[51].mxu1 }
 0x256   :  { %v1501_v2 = vpack.c.bf16 %v1097_v1, %v1094_v47 }
 0x258   :  { %2261 = vmatprep.mubr.bf16.mxu0 %v1501_v2 }
 0x259   :  { %2262 = vmatmul.mubr.bf16.vlgmr.msra.gmra.mrb[48].mxu0 %v1493_v51 }
 0x25a   :  { %4659 = vmatpush3.bf16.msra.mxu0 %v5354_v3  ;;  %v5089_v46 = vpop.f32.mrb[52].mxu1  ;;  %2269 = vmatprep.mubr.bf16.mxu0 %v1502_v0 }
 0x25b   :  { %v1110_v6 = vpop.f32.mrb[53].mxu1  ;;  %4660 = vmatprep.subr.bf16.mxu0 %v5355_v4 }
 0x25c   :  { %v5090_v8 = vpop.f32.mrb[54].mxu1 }
 0x25d   :  { %v1504_v10 = vpack.c.bf16 %v5090_v8, %v5089_v46  ;;  %v1113_v11 = vpop.f32.mrb[55].mxu1  ;;  %v5370_v46 = vld [vmem:[%s6946_s4 + $0x180] sm:$0xff]  }
 0x25e   :  { %v1503_v13 = vpack.c.bf16 %v1113_v11, %v1110_v6  ;;  %4661 = vmatpush3.bf16.msra.mxu0 %v5356_v41  ;;  %v5374_v11 = vld [vmem:[%s6946_s4 + $0x190] sm:$0xff]  }
 0x25f   :  { %4662 = vmatprep.subr.bf16.mxu0 %v5357_v7  ;;  %v5371_v7 = vld [vmem:[%s6946_s4 + $0x1c8] sm:$0xff]  }
 0x261   :  { %2270 = vmatmul.mubr.bf16.gmra.mrb[52].mxu0 %v1494_v28  ;;  %v5369_v28 = vld [vmem:[%s6946_s4 + $0x1c0] sm:$0xff]  }
 0x262   :  { %v5093_v14 = vpop.f32.mrb[56].mxu1  ;;  %2277 = vmatprep.mubr.bf16.mxu0 %v1503_v13  ;;  %4663 = vmatpush3.bf16.msra.mxu0 %v5358_v9 }
 0x263   :  { %v1126_v16 = vpop.f32.mrb[57].mxu1  ;;  %4664 = vmatprep.subr.bf16.mxu0 %v5359_v12 }
 0x264   :  { %v5094_v18 = vpop.f32.mrb[58].mxu1 }
 0x265   :  { %v1506_v20 = vpack.c.bf16 %v5094_v18, %v5093_v14  ;;  %v1129_v21 = vpop.f32.mrb[59].mxu1  ;;  %v5375_v14 = vld [vmem:[%s6946_s4 + $0x1d8] sm:$0xff]   ;;  %v5397_v18 = vld [vmem:[%s6947_s6 + $0x50] sm:$0xff]  }
 0x266   :  { %v1505_v23 = vpack.c.bf16 %v1129_v21, %v1126_v16  ;;  %4665 = vmatpush3.bf16.msra.mxu0 %v5360_v15  ;;  %v5376_v16 = vld [vmem:[%s6946_s4 + $0x198] sm:$0xff]   ;;  %v5377_v21 = vld [vmem:[%s6946_s4 + $0x1e0] sm:$0xff]  }
 0x267   :  { %4666 = vmatprep.subr.bf16.mxu0 %v5361_v17 }
 0x269   :  { %2278 = vmatmul.mubr.bf16.gmra.mrb[56].mxu0 %v1495_v57  ;;  %v5392_v57 = vld [vmem:[%s6947_s6 + $0x48] sm:$0xff]  }
 0x26a   :  { %v5097_v24 = vpop.f32.mrb[60].mxu1  ;;  %2285 = vmatprep.mubr.bf16.mxu0 %v1504_v10  ;;  %4667 = vmatpush3.bf16.msra.mxu0 %v5362_v19  ;;  %v5398_v19 = vld [vmem:[%s6947_s6 + $0x10] sm:$0xff]  }
 0x26b   :  { %v1142_v27 = vpop.f32.mrb[61].mxu1  ;;  %4668 = vmatprep.subr.bf16.mxu0 %v5363_v22  ;;  %4804 = vmatprep.subr.bf16.mxu1 %v5392_v57 }
 0x26c   :  { %v5098_v31 = vpop.f32.mrb[62].mxu1  ;;  %4805 = vmatpush3.bf16.msra.mxu1 %v5393_v59 }
 0x26d   :  { %v1508_v32 = vpack.c.bf16 %v5098_v31, %v5097_v24  ;;  %v1145_v35 = vpop.f32.mrb[63].mxu1  ;;  %4806 = vmatprep.subr.bf16.mxu1 %v5397_v18 }
 0x26e   :  { %v1507_v45 = vpack.c.bf16 %v1145_v35, %v1142_v27  ;;  %4669 = vmatpush3.bf16.msra.mxu0 %v5364_v26  ;;  %v5379_v27 = vld [vmem:[%s6946_s4 + $0x1e8] sm:$0xff]  }
 0x26f   :  { %4670 = vmatprep.subr.bf16.mxu0 %v5365_v29 }
 0x270   :  { %4807 = vmatpush3.bf16.msra.mxu1 %v5398_v19  ;;  %v5391_v19 = vld [vmem:[%s6946_s4 + $0x220] sm:$0xff]  }
 0x271   :  { %2286 = vmatmul.mubr.bf16.gmra.mrb[60].mxu0 %v1496_v55 }
 0x272   :  { %v6108_v49 = vpop.f32.mrb[64].mxu1  ;;  %2293 = vmatprep.mubr.bf16.mxu0 %v1505_v23  ;;  %4671 = vmatpush3.bf16.msra.mxu0 %v5366_v37  ;;  %v5378_v23 = vld [vmem:[%s6946_s4 + $0x1a0] sm:$0xff]   ;;  %v5381_v37 = vld [vmem:[%s6946_s4 + $0x1f0] sm:$0xff]  }
 0x273   :  { %v1158_v25 = vpop.f32.mrb[65].mxu1  ;;  %4672 = vmatprep.subr.bf16.mxu0 %v5367_v43 }
 0x274   :  { %v5102_v30 = vpop.f32.mrb[66].mxu1 }
 0x275   :  { %v1510_v51 = vpack.c.bf16 %v5102_v30, %v6108_v49  ;;  %v1161_v53 = vpop.f32.mrb[67].mxu1 }
 0x276   :  { %v1509_v52 = vpack.c.bf16 %v1161_v53, %v1158_v25  ;;  %4673 = vmatpush3.bf16.msra.mxu0 %v5368_v50  ;;  %v5383_v25 = vld [vmem:[%s6946_s4 + $0x1f8] sm:$0xff]  }
 0x277   :  { %4722 = vmatprep.subr.bf16.mxu0 %v5369_v28 }
 0x279   :  { %2294 = vmatmul.mubr.bf16.gmra.mrb[64].mxu0 %v1497_v60 }
 0x27a   :  { %v6120_v54 = vpop.f32.mrb[68].mxu1  ;;  %2301 = vmatprep.mubr.bf16.mxu0 %v1506_v20 }
 0x27b   :  { %v6122_v55 = vpop.f32.mrb[69].mxu1 }
 0x27c   :  { %v6124_v56 = vpop.f32.mrb[70].mxu1 }
 0x27d   :  { %v1512_v42 = vpack.c.bf16 %v6124_v56, %v6120_v54  ;;  %v6131_v47 = vpop.f32.mrb[71].mxu1 }
 0x27e   :  { %v1511_v39 = vpack.c.bf16 %v6131_v47, %v6122_v55 }
 0x281   :  { %2302 = vmatmul.mubr.bf16.gmra.mrb[68].mxu0 %v1498_v58 }
 0x282   :  { %v6141_v60 = vpop.f32.mrb[72].mxu1  ;;  %2309 = vmatprep.mubr.bf16.mxu0 %v1507_v45  ;;  %v5382_v45 = vld [vmem:[%s6946_s4 + $0x1b0] sm:$0xff]  }
 0x283   :  { %v6143_v48 = vpop.f32.mrb[73].mxu1 }
 0x284   :  { %v6145_v0 = vpop.f32.mrb[74].mxu1 }
 0x285   :  { %v1514_v1 = vpack.c.bf16 %v6145_v0, %v6141_v60  ;;  %v6149_v2 = vpop.f32.mrb[75].mxu1  ;;  %v5400_v0 = vld [vmem:[%s6947_s6 + $0x18] sm:$0xff]  }
 0x286   :  { %v1513_v3 = vpack.c.bf16 %v6149_v2, %v6143_v48 }
 0x289   :  { %2310 = vmatmul.mubr.bf16.gmra.mrb[72].mxu0 %v1499_v63 }
 0x28a   :  { %v6156_v34 = vpop.f32.mrb[76].mxu1  ;;  %2317 = vmatprep.mubr.bf16.mxu0 %v1508_v32  ;;  %v5380_v32 = vld [vmem:[%s6946_s4 + $0x1a8] sm:$0xff]  }
 0x28b   :  { %v6158_v40 = vpop.f32.mrb[77].mxu1 }
 0x28c   :  { %v6160_v58 = vpop.f32.mrb[78].mxu1 }
 0x28d   :  { %v1516_v4 = vpack.c.bf16 %v6160_v58, %v6156_v34  ;;  %v6164_v41 = vpop.f32.mrb[79].mxu1  ;;  %v5389_v34 = vld [vmem:[%s6946_s4 + $0x210] sm:$0xff]  }
 0x28e   :  { %v1515_v44 = vpack.c.bf16 %v6164_v41, %v6158_v40 }
 0x291   :  { %2318 = vmatmul.mubr.bf16.gmra.mrb[76].mxu0 %v1500_v61  ;;  %v5373_v61 = vld [vmem:[%s6946_s4 + $0x1d0] sm:$0xff]  }
 0x292   :  { %v5117_v36 = vpop.f32.mrb[80].mxu1 }
 0x293   :  { %v1222_v62 = vpop.f32.mrb[81].mxu1 }
 0x294   :  { %v5118_v63 = vpop.f32.mrb[82].mxu1 }
 0x295   :  { %v1518_v5 = vpack.c.bf16 %v5118_v63, %v5117_v36  ;;  %v1225_v6 = vpop.f32.mrb[83].mxu1 }
 0x296   :  { %v1517_v8 = vpack.c.bf16 %v1225_v6, %v1222_v62 }
 0x298   :  { %2358 = vmatprep.mubr.bf16.mxu0 %v1517_v8 }
 0x299   :  { %2359 = vmatmul.mubr.bf16.vlgmr.msra.gmra.mrb[80].mxu0 %v1509_v52  ;;  %v5385_v52 = vld [vmem:[%s6946_s4 + $0x200] sm:$0xff]  }
 0x29a   :  { %4723 = vmatpush3.bf16.msra.mxu0 %v5370_v46  ;;  %v5121_v9 = vpop.f32.mrb[84].mxu1  ;;  %2366 = vmatprep.mubr.bf16.mxu0 %v1518_v5 }
 0x29b   :  { %v1238_v38 = vpop.f32.mrb[85].mxu1  ;;  %4724 = vmatprep.subr.bf16.mxu0 %v5371_v7 }
 0x29c   :  { %v5122_v10 = vpop.f32.mrb[86].mxu1 }
 0x29d   :  { %v1520_v12 = vpack.c.bf16 %v5122_v10, %v5121_v9  ;;  %v1241_v13 = vpop.f32.mrb[87].mxu1 }
 0x29e   :  { %v1519_v15 = vpack.c.bf16 %v1241_v13, %v1238_v38  ;;  %4725 = vmatpush3.bf16.msra.mxu0 %v5372_v33 }
 0x29f   :  { %4726 = vmatprep.subr.bf16.mxu0 %v5373_v61 }
 0x2a1   :  { %2367 = vmatmul.mubr.bf16.gmra.mrb[84].mxu0 %v1510_v51  ;;  %v5384_v51 = vld [vmem:[%s6946_s4 + $0x1b8] sm:$0xff]  }
 0x2a2   :  { %v5125_v17 = vpop.f32.mrb[88].mxu1  ;;  %2374 = vmatprep.mubr.bf16.mxu0 %v1519_v15  ;;  %4727 = vmatpush3.bf16.msra.mxu0 %v5374_v11  ;;  %v5388_v11 = vld [vmem:[%s6946_s4 + $0x208] sm:$0xff]  }
 0x2a3   :  { %v1254_v20 = vpop.f32.mrb[89].mxu1  ;;  %4728 = vmatprep.subr.bf16.mxu0 %v5375_v14 }
 0x2a4   :  { %v5126_v22 = vpop.f32.mrb[90].mxu1 }
 0x2a5   :  { %v1522_v24 = vpack.c.bf16 %v5126_v22, %v5125_v17  ;;  %v1257_v26 = vpop.f32.mrb[91].mxu1 }
 0x2a6   :  { %v1521_v29 = vpack.c.bf16 %v1257_v26, %v1254_v20  ;;  %4729 = vmatpush3.bf16.msra.mxu0 %v5376_v16  ;;  %v5390_v16 = vld [vmem:[%s6946_s4 + $0x218] sm:$0xff]  }
 0x2a7   :  { %4730 = vmatprep.subr.bf16.mxu0 %v5377_v21 }
 0x2a9   :  { %2375 = vmatmul.mubr.bf16.gmra.mrb[88].mxu0 %v1511_v39 }
 0x2aa   :  { %v5129_v31 = vpop.f32.mrb[92].mxu1  ;;  %2382 = vmatprep.mubr.bf16.mxu0 %v1520_v12  ;;  %4731 = vmatpush3.bf16.msra.mxu0 %v5378_v23 }
 0x2ab   :  { %v1270_v35 = vpop.f32.mrb[93].mxu1  ;;  %4732 = vmatprep.subr.bf16.mxu0 %v5379_v27  ;;  %v5401_v27 = vld [vmem:[%s6947_s6 + $0x60] sm:$0xff]  }
 0x2ac   :  { %v5130_v43 = vpop.f32.mrb[94].mxu1 }
 0x2ad   :  { %v1524_v49 = vpack.c.bf16 %v5130_v43, %v5129_v31  ;;  %v1273_v50 = vpop.f32.mrb[95].mxu1 }
 0x2ae   :  { %v1523_v28 = vpack.c.bf16 %v1273_v50, %v1270_v35  ;;  %4733 = vmatpush3.bf16.msra.mxu0 %v5380_v32  ;;  %v5395_v32 = vld [vmem:[%s6946_s4 + $0x230] sm:$0xff]  }
 0x2af   :  { %4734 = vmatprep.subr.bf16.mxu0 %v5381_v37 }
 0x2b1   :  { %2383 = vmatmul.mubr.bf16.gmra.mrb[92].mxu0 %v1512_v42 }
 0x2b2   :  { %v6225_v30 = vpop.f32.mrb[96].mxu1  ;;  %2390 = vmatprep.mubr.bf16.mxu0 %v1521_v29  ;;  %4735 = vmatpush3.bf16.msra.mxu0 %v5382_v45  ;;  %v5402_v29 = vld [vmem:[%s6947_s6 + $0x20] sm:$0xff]  }
 0x2b3   :  { %v1286_v53 = vpop.f32.mrb[97].mxu1  ;;  %4736 = vmatprep.subr.bf16.mxu0 %v5383_v25 }
 0x2b4   :  { %v5134_v55 = vpop.f32.mrb[98].mxu1 }
 0x2b5   :  { %v1526_v57 = vpack.c.bf16 %v5134_v55, %v6225_v30  ;;  %v1289_v47 = vpop.f32.mrb[99].mxu1 }
 0x2b6   :  { %v1525_v54 = vpack.c.bf16 %v1289_v47, %v1286_v53  ;;  %4737 = vmatpush3.bf16.msra.mxu0 %v5384_v51  ;;  %v5396_v51 = vld [vmem:[%s6946_s4 + $0x238] sm:$0xff]  }
 0x2b7   :  { %5179 = vmatprep.subr.bf16.mxu0 %v5385_v52 }
 0x2b9   :  { %2391 = vmatmul.mubr.bf16.gmra.mrb[96].mxu0 %v1513_v3  ;;  %v5399_v3 = vld [vmem:[%s6947_s6 + $0x58] sm:$0xff]  }
 0x2ba   :  { %v6237_v56 = vpop.f32.mrb[100].mxu1  ;;  %2398 = vmatprep.mubr.bf16.mxu0 %v1522_v24  ;;  %4808 = vmatprep.subr.bf16.mxu1 %v5399_v3  ;;  %v5394_v24 = vld [vmem:[%s6946_s4 + $0x228] sm:$0xff]  }
 0x2bb   :  { %v1302_v42 = vpop.f32.mrb[101].mxu1  ;;  %4809 = vmatpush3.bf16.msra.mxu1 %v5400_v0 }
 0x2bc   :  { %v6239_v39 = vpop.f32.mrb[102].mxu1  ;;  %4810 = vmatprep.subr.bf16.mxu1 %v5401_v27 }
 0x2bd   :  { %v1528_v59 = vpack.c.bf16 %v6239_v39, %v6237_v56  ;;  %v1305_v36 = vpop.f32.mrb[103].mxu1 }
 0x2be   :  { %v1527_v62 = vpack.c.bf16 %v1305_v36, %v1302_v42 }
 0x2bf   :  { %4811 = vmatpush3.bf16.msra.mxu1 %v5402_v29 }
 0x2c1   :  { %2399 = vmatmul.mubr.bf16.gmra.mrb[100].mxu0 %v1514_v1 }
 0x2c2   :  { %v6246_v63 = vpop.f32.mrb[104].mxu1  ;;  %2406 = vmatprep.mubr.bf16.mxu0 %v1523_v28 }
 0x2c3   :  { %v6248_v48 = vpop.f32.mrb[105].mxu1 }
 0x2c4   :  { %v6250_v2 = vpop.f32.mrb[106].mxu1 }
 0x2c5   :  { %v1530_v46 = vpack.c.bf16 %v6250_v2, %v6246_v63  ;;  %v6257_v5 = vpop.f32.mrb[107].mxu1 }
 0x2c6   :  { %v1529_v60 = vpack.c.bf16 %v6257_v5, %v6248_v48 }
 0x2c9   :  { %2407 = vmatmul.mubr.bf16.gmra.mrb[104].mxu0 %v1515_v44 }
 0x2ca   :  { %v6267_v1 = vpop.f32.mrb[108].mxu1  ;;  %2414 = vmatprep.mubr.bf16.mxu0 %v1524_v49 }
 0x2cb   :  { %v6269_v6 = vpop.f32.mrb[109].mxu1 }
 0x2cc   :  { %v6271_v7 = vpop.f32.mrb[110].mxu1 }
 0x2cd   :  { %v1532_v8 = vpack.c.bf16 %v6271_v7, %v6267_v1  ;;  %v6275_v9 = vpop.f32.mrb[111].mxu1  ;;  %v6369_v1 = vld [vmem:[%s6948_s5] ss:$0 sm:$0xff] }
 0x2ce   :  { %v1531_v33 = vpack.c.bf16 %v6275_v9, %v6269_v6  ;;  %v5404_v9 = vld [vmem:[%s6947_s6 + $0x28] sm:$0xff]  }
 0x2d1   :  { %2415 = vmatmul.mubr.bf16.gmra.mrb[108].mxu0 %v1516_v4 }
 0x2d2   :  { %v5149_v40 = vpop.f32.mrb[112].mxu1 }
 0x2d3   :  { %v1350_v41 = vpop.f32.mrb[113].mxu1 }
 0x2d4   :  { %v5150_v44 = vpop.f32.mrb[114].mxu1 }
 0x2d5   :  { %v1534_v38 = vpack.c.bf16 %v5150_v44, %v5149_v40  ;;  %v1353_v61 = vpop.f32.mrb[115].mxu1 }
 0x2d6   :  { %v1533_v10 = vpack.c.bf16 %v1353_v61, %v1350_v41 }
 0x2d8   :  { %2455 = vmatprep.mubr.bf16.mxu0 %v1533_v10 }
 0x2d9   :  { %2456 = vmatmul.mubr.bf16.vlgmr.msra.gmra.mrb[112].mxu0 %v1525_v54 }
 0x2da   :  { %5180 = vmatpush3.bf16.msra.mxu0 %v5385_v52  ;;  %2463 = vmatprep.mubr.bf16.mxu0 %v1534_v38  ;;  %v5153_v12 = vpop.f32.mrb[116].mxu1 }
 0x2db   :  { %v1366_v13 = vpop.f32.mrb[117].mxu1  ;;  %5181 = vmatprep.subr.bf16.mxu0 %v5388_v11 }
 0x2dc   :  { %v5154_v58 = vpop.f32.mrb[118].mxu1 }
 0x2dd   :  { %v1536_v4 = vpack.c.bf16 %v5154_v58, %v5153_v12  ;;  %v1369_v14 = vpop.f32.mrb[119].mxu1 }
 0x2de   :  { %5182 = vmatpush3.bf16.msra.mxu0 %v5388_v11  ;;  %v1535_v15 = vpack.c.bf16 %v1369_v14, %v1366_v13 }
 0x2df   :  { %5183 = vmatprep.subr.bf16.mxu0 %v5389_v34 }
 0x2e1   :  { %2464 = vmatmul.mubr.bf16.gmra.mrb[116].mxu0 %v1526_v57 }
 0x2e2   :  { %2471 = vmatprep.mubr.bf16.mxu0 %v1535_v15  ;;  %5184 = vmatpush3.bf16.msra.mxu0 %v5389_v34  ;;  %v5157_v17 = vpop.f32.mrb[120].mxu1 }
 0x2e3   :  { %v1382_v18 = vpop.f32.mrb[121].mxu1  ;;  %5185 = vmatprep.subr.bf16.mxu0 %v5390_v16 }
 0x2e4   :  { %v5158_v20 = vpop.f32.mrb[122].mxu1 }
 0x2e5   :  { %v1538_v21 = vpack.c.bf16 %v5158_v20, %v5157_v17  ;;  %v1385_v22 = vpop.f32.mrb[123].mxu1 }
 0x2e6   :  { %5186 = vmatpush3.bf16.msra.mxu0 %v5390_v16  ;;  %v1537_v23 = vpack.c.bf16 %v1385_v22, %v1382_v18 }
 0x2e7   :  { %5187 = vmatprep.subr.bf16.mxu0 %v5391_v19 }
 0x2e9   :  { %2472 = vmatmul.mubr.bf16.gmra.mrb[120].mxu0 %v1527_v62 }
 0x2ea   :  { %2479 = vmatprep.mubr.bf16.mxu0 %v1536_v4  ;;  %5188 = vmatpush3.bf16.msra.mxu0 %v5391_v19  ;;  %v6297_v26 = vpop.f32.mrb[124].mxu1 }
 0x2eb   :  { %v1398_v31 = vpop.f32.mrb[125].mxu1  ;;  %5189 = vmatprep.subr.bf16.mxu0 %v5394_v24 }
 0x2ec   :  { %v4546_v35 = vpop.f32.mrb[16].mxu0  ;;  %v5162_v37 = vpop.f32.mrb[126].mxu1 }
 0x2ed   :  { %v4547_v43 = vpop.f32.mrb[17].mxu0  ;;  %v1540_v45 = vpack.c.bf16 %v5162_v37, %v6297_v26  ;;  %v1401_v49 = vpop.f32.mrb[127].mxu1 }
 0x2ee   :  { %v6309_v50 = vadd.f32 %v4547_v43, %v4546_v35  ;;  %v4549_v25 = vpop.f32.mrb[18].mxu0  ;;  %5190 = vmatpush3.bf16.msra.mxu0 %v5394_v24  ;;  %v1539_v28 = vpack.c.bf16 %v1401_v49, %v1398_v31 }
 0x2ef   :  { %v4550_v30 = vpop.f32.mrb[19].mxu0  ;;  %5191 = vmatprep.subr.bf16.mxu0 %v5395_v32 }
 0x2f0   :  { %v6314_v53 = vadd.f32 %v4550_v30, %v4549_v25 }
 0x2f1   :  { %2480 = vmatmul.mubr.bf16.gmra.mrb[124].mxu0 %v1528_v59 }
 0x2f2   :  { %2487 = vmatprep.mubr.bf16.mxu0 %v1537_v23  ;;  %5192 = vmatpush3.bf16.msra.mxu0 %v5395_v32  ;;  %v6319_v52 = vpop.f32.mrb[128].mxu1  ;;  %v5403_v23 = vld [vmem:[%s6947_s6 + $0x68] sm:$0xff]  }
 0x2f3   :  { %v1414_v55 = vpop.f32.mrb[129].mxu1  ;;  %5193 = vmatprep.subr.bf16.mxu0 %v5396_v51  ;;  %4812 = vmatprep.subr.bf16.mxu1 %v5403_v23 }
 0x2f4   :  { %v4552_v57 = vpop.f32.mrb[20].mxu0  ;;  %v6321_v47 = vpop.f32.mrb[130].mxu1  ;;  %4813 = vmatpush3.bf16.msra.mxu1 %v5404_v9 }
 0x2f5   :  { %v4553_v54 = vpop.f32.mrb[21].mxu0  ;;  %v1542_v42 = vpack.c.bf16 %v6321_v47, %v6319_v52  ;;  %v1417_v36 = vpop.f32.mrb[131].mxu1 }
 0x2f6   :  { %v6325_v62 = vadd.f32 %v4553_v54, %v4552_v57  ;;  %v4555_v3 = vpop.f32.mrb[22].mxu0  ;;  %5194 = vmatpush3.bf16.msra.mxu0 %v5396_v51  ;;  %v1541_v56 = vpack.c.bf16 %v1417_v36, %v1414_v55 }
 0x2f7   :  { %v4556_v39 = vpop.f32.mrb[23].mxu0 }
 0x2f8   :  { %v6327_v59 = vadd.f32 %v4556_v39, %v4555_v3 }
 0x2f9   :  { %2488 = vmatmul.mubr.bf16.gmra.mrb[128].mxu0 %v1529_v60 }
 0x2fa   :  { %2495 = vmatprep.mubr.bf16.mxu0 %v1538_v21  ;;  %v6332_v0 = vpop.f32.mrb[132].mxu1 }
 0x2fb   :  { %v1430_v40 = vpop.f32.mrb[133].mxu1 }
 0x2fc   :  { %v4558_v41 = vpop.f32.mrb[24].mxu0  ;;  %v5170_v44 = vpop.f32.mrb[134].mxu1 }
 0x2fd   :  { %v4559_v38 = vpop.f32.mrb[25].mxu0  ;;  %v1544_v61 = vpack.c.bf16 %v5170_v44, %v6332_v0  ;;  %v1433_v10 = vpop.f32.mrb[135].mxu1  ;;  %v2167_v44 = vadd.f32 %v6309_v50, %v6369_v1 }
 0x2fe   :  { %v6335_v11 = vadd.f32 %v4559_v38, %v4558_v41  ;;  %v4561_v12 = vpop.f32.mrb[26].mxu0  ;;  %v1543_v13 = vpack.c.bf16 %v1433_v10, %v1430_v40 }
 0x2ff   :  { %v4562_v34 = vpop.f32.mrb[27].mxu0 }
 0x300   :  { %v6337_v58 = vadd.f32 %v4562_v34, %v4561_v12  ;;  %v2170_v12 = vadd.f32 %v6314_v53, %v6369_v1  ;;  %v2175_v53 = vadd.f32 %v6325_v62, %v6369_v1 }
 0x301   :  { %2496 = vmatmul.mubr.bf16.gmra.mrb[132].mxu0 %v1530_v46 }
 0x302   :  { %2503 = vmatprep.mubr.bf16.mxu0 %v1539_v28  ;;  %v5173_v48 = vpop.f32.mrb[136].mxu1  ;;  %v2186_v62 = vadd.f32 %v6337_v58, %v6369_v1 }
 0x303   :  { %v1446_v5 = vpop.f32.mrb[137].mxu1 }
 0x304   :  { %v4564_v60 = vpop.f32.mrb[28].mxu0  ;;  %v5174_v4 = vpop.f32.mrb[138].mxu1 }
 0x305   :  { %v4565_v14 = vpop.f32.mrb[29].mxu0  ;;  %v1546_v15 = vpack.c.bf16 %v5174_v4, %v5173_v48  ;;  %v1449_v16 = vpop.f32.mrb[139].mxu1  ;;  %v5405_v48 = vld [vmem:[%s6947_s6 + $0x70] sm:$0xff]  }
 0x306   :  { %v6342_v17 = vadd.f32 %v4565_v14, %v4564_v60  ;;  %v4567_v18 = vpop.f32.mrb[30].mxu0  ;;  %v1545_v19 = vpack.c.bf16 %v1449_v16, %v1446_v5  ;;  %v5406_v5 = vld [vmem:[%s6947_s6 + $0x30] sm:$0xff]   ;;  %4814 = vmatprep.subr.bf16.mxu1 %v5405_v48 }
 0x307   :  { %v4568_v20 = vpop.f32.mrb[31].mxu0  ;;  %4815 = vmatpush3.bf16.msra.mxu1 %v5406_v5  ;;  %v5412_v5 = vld [vmem:[%s6947_s6 + $0x88] sm:$0xff]  }
 0x308   :  { %v6344_v21 = vadd.f32 %v4568_v20, %v4567_v18  ;;  %v2178_v18 = vadd.f32 %v6327_v59, %v6369_v1  ;;  %v2191_v9 = vadd.f32 %v6342_v17, %v6369_v1 }
 0x309   :  { %2504 = vmatmul.mubr.bf16.gmra.mrb[136].mxu0 %v1531_v33 }
 0x30a   :  { %2511 = vmatprep.mubr.bf16.mxu0 %v1540_v45  ;;  %v5177_v63 = vpop.f32.mrb[140].mxu1 }
 0x30b   :  { %v1462_v2 = vpop.f32.mrb[141].mxu1 }
 0x30c   :  { %v4570_v46 = vpop.f32.mrb[32].mxu0  ;;  %v5178_v22 = vpop.f32.mrb[142].mxu1 }
 0x30d   :  { %v4571_v24 = vpop.f32.mrb[33].mxu0  ;;  %v1548_v26 = vpack.c.bf16 %v5178_v22, %v5177_v63  ;;  %v1465_v27 = vpop.f32.mrb[143].mxu1  ;;  %v2183_v22 = vadd.f32 %v6335_v11, %v6369_v1  ;;  %v2194_v11 = vadd.f32 %v6344_v21, %v6369_v1 }
 0x30e   :  { %v6352_v29 = vadd.f32 %v4571_v24, %v4570_v46  ;;  %v4573_v31 = vpop.f32.mrb[34].mxu0  ;;  %v1547_v32 = vpack.c.bf16 %v1465_v27, %v1462_v2 }
 0x30f   :  { %v4574_v35 = vpop.f32.mrb[35].mxu0 }
 0x310   :  { %v6354_v6 = vadd.f32 %v4574_v35, %v4573_v31 }
 0x311   :  { %2512 = vmatmul.mubr.bf16.gmra.mrb[140].mxu0 %v1532_v8 }
 0x312   :  { %5195 = vmatprep.mubr.bf16.mxu0 %v1541_v56  ;;  %v2202_v17 = vadd.f32 %v6354_v6, %v6369_v1 }
 0x314   :  { %v4576_v33 = vpop.f32.mrb[36].mxu0 }
 0x315   :  { %v4577_v37 = vpop.f32.mrb[37].mxu0 }
 0x316   :  { %v6362_v43 = vadd.f32 %v4577_v37, %v4576_v33  ;;  %v4579_v45 = vpop.f32.mrb[38].mxu0 }
 0x317   :  { %v4580_v49 = vpop.f32.mrb[39].mxu0 }
 0x318   :  { %v6364_v25 = vadd.f32 %v4580_v49, %v4579_v45 }
 0x319   :  { %5196 = vmatmul.mubr.bf16.vlgmr.msra.gmra.mrb[144].mxu0 %v1542_v42 }
 0x31a   :  { %5199 = vmatprep.mubr.bf16.mxu0 %v1543_v13 }
 0x31c   :  { %v4582_v28 = vpop.f32.mrb[40].mxu0 }
 0x31d   :  { %v4583_v30 = vpop.f32.mrb[41].mxu0 }
 0x31e   :  { %v4584_v51 = vadd.f32 %v4583_v30, %v4582_v28  ;;  %v4585_v52 = vpop.f32.mrb[42].mxu0 }
 0x31f   :  { %v4586_v7 = vpop.f32.mrb[43].mxu0 }
 0x320   :  { %v6372_v8 = vadd.f32 %v4584_v51, %v6369_v1  ;;  %v4587_v55 = vadd.f32 %v4586_v7, %v4585_v52  ;;  %v2199_v52 = vadd.f32 %v6352_v29, %v6369_v1  ;;  %v5409_v29 = vld [vmem:[%s6947_s6 + $0xc0] sm:$0xff]  }
 0x321   :  { %5200 = vmatmul.mubr.bf16.gmra.mrb[148].mxu0 %v1544_v61  ;;  %4824 = vmatprep.subr.bf16.mxu0 %v5409_v29 }
 0x322   :  { %v6375_v57 = vadd.f32 %v4587_v55, %v6369_v1  ;;  %5203 = vmatprep.mubr.bf16.mxu0 %v1545_v19 }
 0x324   :  { %v4588_v47 = vpop.f32.mrb[44].mxu0 }
 0x325   :  { %v4589_v54 = vpop.f32.mrb[45].mxu0 }
 0x326   :  { %v4590_v42 = vadd.f32 %v4589_v54, %v4588_v47  ;;  %v4591_v36 = vpop.f32.mrb[46].mxu0 }
 0x327   :  { %v4592_v3 = vpop.f32.mrb[47].mxu0 }
 0x328   :  { %v6378_v56 = vadd.f32 %v4590_v42, %v6369_v1  ;;  %v4593_v39 = vadd.f32 %v4592_v3, %v4591_v36  ;;  %v5407_v3 = vld [vmem:[%s6947_s6 + $0x78] sm:$0xff]  }
 0x329   :  { %5204 = vmatmul.mubr.bf16.gmra.mrb[152].mxu0 %v1546_v15  ;;  %4816 = vmatprep.subr.bf16.mxu1 %v5407_v3 }
 0x32a   :  { %v6381_v0 = vadd.f32 %v4593_v39, %v6369_v1  ;;  %5207 = vmatprep.mubr.bf16.mxu0 %v1547_v32 }
 0x32c   :  { %v4610_v40 = vpop.f32.mrb[48].mxu0 }
 0x32d   :  { %v4611_v41 = vpop.f32.mrb[49].mxu0 }
 0x32e   :  { %v4612_v38 = vadd.f32 %v4611_v41, %v4610_v40  ;;  %v4613_v61 = vpop.f32.mrb[50].mxu0  ;;  %v2207_v40 = vadd.f32 %v6362_v43, %v6369_v1  ;;  %v5411_v43 = vld [vmem:[%s6947_s6 + $0xc8] sm:$0xff]  }
 0x32f   :  { %v4614_v10 = vpop.f32.mrb[51].mxu0 }
 0x330   :  { %v6387_v13 = vadd.f32 %v4612_v38, %v2167_v44  ;;  %v4615_v34 = vadd.f32 %v4614_v10, %v4613_v61  ;;  %v5408_v44 = vld [vmem:[%s6947_s6 + $0x38] sm:$0xff]   ;;  %v5410_v38 = vld [vmem:[%s6947_s6 + $0x80] sm:$0xff]   ;;  %v2210_v10 = vadd.f32 %v6364_v25, %v6369_v1  ;;  %v5413_v25 = vld [vmem:[%s6947_s6 + $0xd0] sm:$0xff]  }
 0x331   :  { %5208 = vmatmul.mubr.bf16.gmra.mrb[156].mxu0 %v1548_v26  ;;  %4817 = vmatpush3.bf16.msra.mxu1 %v5408_v44 }
 0x332   :  { %v6395_v60 = vadd.f32 %v4615_v34, %v2170_v12  ;;  %4825 = vmatpush3.bf16.msra.mxu0 %v5410_v38 }
 0x333   :  { %4826 = vmatprep.subr.bf16.mxu0 %v5411_v43 }
 0x334   :  { %v4616_v50 = vpop.f32.mrb[52].mxu0 }
 0x335   :  { %v4617_v4 = vpop.f32.mrb[53].mxu0 }
 0x336   :  { %v4618_v14 = vadd.f32 %v4617_v4, %v4616_v50  ;;  %v4619_v15 = vpop.f32.mrb[54].mxu0  ;;  %4827 = vmatpush3.bf16.msra.mxu0 %v5412_v5 }
 0x337   :  { %v4620_v16 = vpop.f32.mrb[55].mxu0  ;;  %4828 = vmatprep.subr.bf16.mxu0 %v5413_v25 }
 0x338   :  { %v6401_v19 = vadd.f32 %v4618_v14, %v2175_v53  ;;  %v4621_v20 = vadd.f32 %v4620_v16, %v4619_v15  ;;  %v5414_v14 = vld [vmem:[%s6947_s6 + $0x90] sm:$0xff]  }
 0x33a   :  { %v6403_v63 = vadd.f32 %v4621_v20, %v2178_v18  ;;  %4829 = vmatpush3.bf16.msra.mxu0 %v5414_v14  ;;  %v5415_v20 = vld [vmem:[%s6947_s6 + $0xd8] sm:$0xff]  }
 0x33b   :  { %4830 = vmatprep.subr.bf16.mxu0 %v5415_v20 }
 0x33c   :  { %v4622_v2 = vpop.f32.mrb[56].mxu0 }
 0x33d   :  { %v4623_v46 = vpop.f32.mrb[57].mxu0 }
 0x33e   :  { %v4624_v23 = vadd.f32 %v4623_v46, %v4622_v2  ;;  %v4625_v24 = vpop.f32.mrb[58].mxu0  ;;  %v5416_v46 = vld [vmem:[%s6947_s6 + $0x98] sm:$0xff]  }
 0x33f   :  { %v4626_v26 = vpop.f32.mrb[59].mxu0  ;;  %4831 = vmatpush3.bf16.msra.mxu0 %v5416_v46 }
 0x340   :  { %v6409_v27 = vadd.f32 %v4624_v23, %v2183_v22  ;;  %v4627_v31 = vadd.f32 %v4626_v26, %v4625_v24 }
 0x342   :  { %v6411_v59 = vadd.f32 %v4627_v31, %v2186_v62  ;;  %v5418_v62 = vld [vmem:[%s6947_s6 + $0xa0] sm:$0xff]  }
 0x344   :  { %v4628_v32 = vpop.f32.mrb[60].mxu0 }
 0x345   :  { %v4629_v35 = vpop.f32.mrb[61].mxu0 }
 0x346   :  { %v4630_v33 = vadd.f32 %v4629_v35, %v4628_v32  ;;  %v4631_v37 = vpop.f32.mrb[62].mxu0  ;;  %v5419_v35 = vld [vmem:[%s6947_s6 + $0xe8] sm:$0xff]  }
 0x347   :  { %v4632_v45 = vpop.f32.mrb[63].mxu0 }
 0x348   :  { %v6417_v49 = vadd.f32 %v4630_v33, %v2191_v9  ;;  %v4633_v28 = vadd.f32 %v4632_v45, %v4631_v37  ;;  %v5420_v33 = vld [vmem:[%s6947_s6 + $0xa8] sm:$0xff]  }
 0x34a   :  { %v6419_v58 = vadd.f32 %v4633_v28, %v2194_v11 }
 0x34c   :  { %v4634_v30 = vpop.f32.mrb[64].mxu0 }
 0x34d   :  { %v4635_v51 = vpop.f32.mrb[65].mxu0 }
 0x34e   :  { %v4636_v7 = vadd.f32 %v4635_v51, %v4634_v30  ;;  %v4637_v55 = vpop.f32.mrb[66].mxu0  ;;  %v5422_v30 = vld [vmem:[%s6947_s6 + $0xb0] sm:$0xff]  }
 0x34f   :  { %v4638_v47 = vpop.f32.mrb[67].mxu0 }
 0x350   :  { %v6425_v54 = vadd.f32 %v4636_v7, %v2199_v52  ;;  %v4639_v42 = vadd.f32 %v4638_v47, %v4637_v55  ;;  %v5423_v7 = vld [vmem:[%s6947_s6 + $0xf8] sm:$0xff]  }
 0x351   :  { %v5424_v47 = vld [vmem:[%s6947_s6 + $0xb8] sm:$0xff]  }
 0x352   :  { %v6427_v21 = vadd.f32 %v4639_v42, %v2202_v17 }
 0x354   :  { %v4640_v36 = vpop.f32.mrb[68].mxu0 }
 0x355   :  { %v4641_v39 = vpop.f32.mrb[69].mxu0 }
 0x356   :  { %v4642_v41 = vadd.f32 %v4641_v39, %v4640_v36  ;;  %v4643_v6 = vpop.f32.mrb[70].mxu0  ;;  %v5426_v39 = vld [vmem:[%s6947_s6 + $0x140] sm:$0xff]  }
 0x357   :  { %v4644_v61 = vpop.f32.mrb[71].mxu0  ;;  %4846 = vmatprep.subr.bf16.mxu1 %v5426_v39 }
 0x358   :  { %v6445_v12 = vadd.f32 %v4642_v41, %v2207_v40  ;;  %v4645_v34 = vadd.f32 %v4644_v61, %v4643_v6 }
 0x35a   :  { %v6450_v48 = vadd.f32 %v4645_v34, %v2210_v10 }
 0x35c   :  { %v4646_v50 = vpop.f32.mrb[72].mxu0 }
 0x35d   :  { %v4647_v4 = vpop.f32.mrb[73].mxu0 }
 0x35e   :  { %v4648_v1 = vadd.f32 %v4647_v4, %v4646_v50  ;;  %v4649_v53 = vpop.f32.mrb[74].mxu0 }
 0x35f   :  { %v4650_v15 = vpop.f32.mrb[75].mxu0 }
 0x360   :  { %v6462_v16 = vadd.f32 %v4648_v1, %v6372_v8  ;;  %v4651_v18 = vadd.f32 %v4650_v15, %v4649_v53  ;;  %v5417_v8 = vld [vmem:[%s6947_s6 + $0xe0] sm:$0xff]  }
 0x361   :  { %4832 = vmatprep.subr.bf16.mxu0 %v5417_v8 }
 0x362   :  { %v6468_v2 = vadd.f32 %v4651_v18, %v6375_v57  ;;  %4833 = vmatpush3.bf16.msra.mxu0 %v5418_v62 }
 0x363   :  { %4834 = vmatprep.subr.bf16.mxu0 %v5419_v35 }
 0x364   :  { %v4652_v22 = vpop.f32.mrb[76].mxu0 }
 0x365   :  { %v4653_v23 = vpop.f32.mrb[77].mxu0 }
 0x366   :  { %v4654_v24 = vadd.f32 %v4653_v23, %v4652_v22  ;;  %v4655_v26 = vpop.f32.mrb[78].mxu0  ;;  %4835 = vmatpush3.bf16.msra.mxu0 %v5420_v33 }
 0x367   :  { %v4656_v57 = vpop.f32.mrb[79].mxu0 }
 0x368   :  { %v6480_v31 = vadd.f32 %v4654_v24, %v6378_v56  ;;  %v4657_v32 = vadd.f32 %v4656_v57, %v4655_v26  ;;  %v5421_v56 = vld [vmem:[%s6947_s6 + $0xf0] sm:$0xff]  }
 0x369   :  { %4836 = vmatprep.subr.bf16.mxu0 %v5421_v56 }
 0x36a   :  { %v6486_v9 = vadd.f32 %v4657_v32, %v6381_v0  ;;  %4837 = vmatpush3.bf16.msra.mxu0 %v5422_v30 }
 0x36b   :  { %4838 = vmatprep.subr.bf16.mxu0 %v5423_v7 }
 0x36c   :  { %v4674_v37 = vpop.f32.mrb[80].mxu0 }
 0x36d   :  { %v4675_v45 = vpop.f32.mrb[81].mxu0 }
 0x36e   :  { %v4676_v11 = vadd.f32 %v4675_v45, %v4674_v37  ;;  %v4677_v28 = vpop.f32.mrb[82].mxu0  ;;  %4839 = vmatpush3.bf16.msra.mxu0 %v5424_v47 }
 0x36f   :  { %v4678_v0 = vpop.f32.mrb[83].mxu0 }
 0x370   :  { %v6498_v51 = vadd.f32 %v4676_v11, %v6387_v13  ;;  %v4679_v52 = vadd.f32 %v4678_v0, %v4677_v28  ;;  %v5425_v13 = vld [vmem:[%s6947_s6 + $0x1c0] sm:$0xff]  }
 0x371   :  { %4868 = vmatprep.subr.bf16.mxu0 %v5425_v13 }
 0x372   :  { %v6504_v55 = vadd.f32 %v4679_v52, %v6395_v60 }
 0x374   :  { %v4680_v17 = vpop.f32.mrb[84].mxu0 }
 0x375   :  { %v4681_v42 = vpop.f32.mrb[85].mxu0 }
 0x376   :  { %v4682_v36 = vadd.f32 %v4681_v42, %v4680_v17  ;;  %v4683_v3 = vpop.f32.mrb[86].mxu0 }
 0x377   :  { %v4684_v60 = vpop.f32.mrb[87].mxu0 }
 0x378   :  { %v6516_v29 = vadd.f32 %v4682_v36, %v6401_v19  ;;  %v4685_v40 = vadd.f32 %v4684_v60, %v4683_v3 }
 0x37a   :  { %v6519_v41 = vadd.f32 %v4685_v40, %v6403_v63 }
 0x37c   :  { %v4686_v6 = vpop.f32.mrb[88].mxu0 }
 0x37d   :  { %v4687_v44 = vpop.f32.mrb[89].mxu0 }
 0x37e   :  { %v4688_v38 = vadd.f32 %v4687_v44, %v4686_v6  ;;  %v4689_v61 = vpop.f32.mrb[90].mxu0 }
 0x37f   :  { %v4690_v10 = vpop.f32.mrb[91].mxu0 }
 0x380   :  { %v6522_v34 = vadd.f32 %v4688_v38, %v6409_v27  ;;  %v4691_v43 = vadd.f32 %v4690_v10, %v4689_v61 }
 0x382   :  { %v6525_v5 = vadd.f32 %v4691_v43, %v6411_v59 }
 0x384   :  { %v4692_v50 = vpop.f32.mrb[92].mxu0 }
 0x385   :  { %v4693_v19 = vpop.f32.mrb[93].mxu0 }
 0x386   :  { %v4694_v4 = vadd.f32 %v4693_v19, %v4692_v50  ;;  %v4695_v25 = vpop.f32.mrb[94].mxu0 }
 0x387   :  { %v4696_v1 = vpop.f32.mrb[95].mxu0 }
 0x388   :  { %v6528_v63 = vadd.f32 %v4694_v4, %v6417_v49  ;;  %v4697_v53 = vadd.f32 %v4696_v1, %v4695_v25 }
 0x38a   :  { %v6531_v14 = vadd.f32 %v4697_v53, %v6419_v58 }
 0x38c   :  { %v4698_v15 = vpop.f32.mrb[96].mxu0 }
 0x38d   :  { %v4699_v18 = vpop.f32.mrb[97].mxu0 }
 0x38e   :  { %v4700_v27 = vadd.f32 %v4699_v18, %v4698_v15  ;;  %v4701_v20 = vpop.f32.mrb[98].mxu0 }
 0x38f   :  { %v4702_v46 = vpop.f32.mrb[99].mxu0 }
 0x390   :  { %v6534_v59 = vadd.f32 %v4700_v27, %v6425_v54  ;;  %v4703_v22 = vadd.f32 %v4702_v46, %v4701_v20 }
 0x392   :  { %v6537_v23 = vadd.f32 %v4703_v22, %v6427_v21 }
 0x394   :  { %v4704_v8 = vpop.f32.mrb[100].mxu0 }
 0x395   :  { %v4705_v24 = vpop.f32.mrb[101].mxu0 }
 0x396   :  { %v4706_v49 = vadd.f32 %v4705_v24, %v4704_v8  ;;  %v4707_v26 = vpop.f32.mrb[102].mxu0 }
 0x397   :  { %v4708_v62 = vpop.f32.mrb[103].mxu0 }
 0x398   :  { %v6540_v58 = vadd.f32 %v4706_v49, %v6445_v12  ;;  %v4709_v57 = vadd.f32 %v4708_v62, %v4707_v26 }
 0x39a   :  { %v6543_v32 = vadd.f32 %v4709_v57, %v6450_v48 }
 0x39c   :  { %v4710_v35 = vpop.f32.mrb[104].mxu0 }
 0x39d   :  { %v4711_v33 = vpop.f32.mrb[105].mxu0 }
 0x39e   :  { %v4712_v54 = vadd.f32 %v4711_v33, %v4710_v35  ;;  %v4713_v37 = vpop.f32.mrb[106].mxu0 }
 0x39f   :  { %v4714_v45 = vpop.f32.mrb[107].mxu0 }
 0x3a0   :  { %v6546_v21 = vadd.f32 %v4712_v54, %v6462_v16  ;;  %v4715_v56 = vadd.f32 %v4714_v45, %v4713_v37 }
 0x3a2   :  { %v6549_v11 = vadd.f32 %v4715_v56, %v6468_v2 }
 0x3a4   :  { %v4716_v28 = vpop.f32.mrb[108].mxu0 }
 0x3a5   :  { %v4717_v30 = vpop.f32.mrb[109].mxu0 }
 0x3a6   :  { %v4718_v12 = vadd.f32 %v4717_v30, %v4716_v28  ;;  %v4719_v0 = vpop.f32.mrb[110].mxu0 }
 0x3a7   :  { %v4720_v52 = vpop.f32.mrb[111].mxu0 }
 0x3a8   :  { %v6552_v48 = vadd.f32 %v4718_v12, %v6480_v31  ;;  %v4721_v7 = vadd.f32 %v4720_v52, %v4719_v0 }
 0x3aa   :  { %v6555_v47 = vadd.f32 %v4721_v7, %v6486_v9 }
 0x3ac   :  { %v4738_v17 = vpop.f32.mrb[112].mxu0 }
 0x3ad   :  { %v4739_v42 = vpop.f32.mrb[113].mxu0 }
 0x3ae   :  { %v4740_v16 = vadd.f32 %v4739_v42, %v4738_v17  ;;  %v4741_v13 = vpop.f32.mrb[114].mxu0 }
 0x3af   :  { %v4742_v36 = vpop.f32.mrb[115].mxu0 }
 0x3b0   :  { %v4743_v3 = vadd.f32 %v4742_v36, %v4741_v13  ;;  %v2458_v2 = vadd.f32 %v4740_v16, %v6498_v51 }
 0x3b2   :  { %v6559_v39 = vadd.f32 %v4743_v3, %v6504_v55 }
 0x3b4   :  { %v4744_v60 = vpop.f32.mrb[116].mxu0 }
 0x3b5   :  { %v4745_v40 = vpop.f32.mrb[117].mxu0 }
 0x3b6   :  { %v4746_v6 = vadd.f32 %v4745_v40, %v4744_v60  ;;  %v4747_v31 = vpop.f32.mrb[118].mxu0 }
 0x3b7   :  { %v4748_v44 = vpop.f32.mrb[119].mxu0 }
 0x3b8   :  { %v4749_v38 = vadd.f32 %v4748_v44, %v4747_v31  ;;  %v2466_v9 = vadd.f32 %v4746_v6, %v6516_v29 }
 0x3ba   :  { %v2469_v61 = vadd.f32 %v4749_v38, %v6519_v41 }
 0x3bc   :  { %v4750_v10 = vpop.f32.mrb[120].mxu0 }
 0x3bd   :  { %v4751_v43 = vpop.f32.mrb[121].mxu0 }
 0x3be   :  { %v4752_v50 = vadd.f32 %v4751_v43, %v4750_v10  ;;  %v4753_v19 = vpop.f32.mrb[122].mxu0 }
 0x3bf   :  { %v4754_v4 = vpop.f32.mrb[123].mxu0 }
 0x3c0   :  { %v4755_v25 = vadd.f32 %v4754_v4, %v4753_v19  ;;  %v2474_v51 = vadd.f32 %v4752_v50, %v6522_v34 }
 0x3c2   :  { %v6565_v55 = vadd.f32 %v4755_v25, %v6525_v5 }
 0x3c4   :  { %v4756_v1 = vpop.f32.mrb[124].mxu0 }
 0x3c5   :  { %v4757_v53 = vpop.f32.mrb[125].mxu0 }
 0x3c6   :  { %v4758_v15 = vadd.f32 %v4757_v53, %v4756_v1  ;;  %v4759_v18 = vpop.f32.mrb[126].mxu0  ;;  %v5429_v53 = vld [vmem:[%s6947_s6 + $0x1c8] sm:$0xff]  }
 0x3c7   :  { %v4760_v27 = vpop.f32.mrb[127].mxu0 }
 0x3c8   :  { %v4761_v20 = vadd.f32 %v4760_v27, %v4759_v18  ;;  %v2482_v29 = vadd.f32 %v4758_v15, %v6528_v63  ;;  %v5430_v27 = vld [vmem:[%s6947_s6 + $0x148] sm:$0xff]  }
 0x3ca   :  { %v2485_v41 = vadd.f32 %v4761_v20, %v6531_v14 }
 0x3cc   :  { %v4762_v46 = vpop.f32.mrb[128].mxu0 }
 0x3cd   :  { %v4763_v22 = vpop.f32.mrb[129].mxu0 }
 0x3ce   :  { %v4764_v8 = vadd.f32 %v4763_v22, %v4762_v46  ;;  %v4765_v24 = vpop.f32.mrb[130].mxu0  ;;  %v5431_v46 = vld [vmem:[%s6947_s6 + $0x188] sm:$0xff]  }
 0x3cf   :  { %v4766_v49 = vpop.f32.mrb[131].mxu0 }
 0x3d0   :  { %v4767_v26 = vadd.f32 %v4766_v49, %v4765_v24  ;;  %v6570_v34 = vadd.f32 %v4764_v8, %v6534_v59  ;;  %v5432_v8 = vld [vmem:[%s6947_s6 + $0x108] sm:$0xff]   ;;  %v5434_v49 = vld [vmem:[%s6947_s6 + $0x150] sm:$0xff]  }
 0x3d2   :  { %v6573_v5 = vadd.f32 %v4767_v26, %v6537_v23 }
 0x3d4   :  { %v4768_v62 = vpop.f32.mrb[132].mxu0 }
 0x3d5   :  { %v4769_v57 = vpop.f32.mrb[133].mxu0 }
 0x3d6   :  { %v4770_v35 = vadd.f32 %v4769_v57, %v4768_v62  ;;  %v4771_v33 = vpop.f32.mrb[134].mxu0 }
 0x3d7   :  { %v4772_v54 = vpop.f32.mrb[135].mxu0 }
 0x3d8   :  { %v4773_v63 = vadd.f32 %v4772_v54, %v4771_v33  ;;  %v6576_v14 = vadd.f32 %v4770_v35, %v6540_v58  ;;  %v5435_v54 = vld [vmem:[%s6947_s6 + $0x190] sm:$0xff]  }
 0x3da   :  { %v6579_v37 = vadd.f32 %v4773_v63, %v6543_v32 }
 0x3dc   :  { %v4774_v45 = vpop.f32.mrb[136].mxu0 }
 0x3dd   :  { %v4775_v56 = vpop.f32.mrb[137].mxu0 }
 0x3de   :  { %v4776_v28 = vadd.f32 %v4775_v56, %v4774_v45  ;;  %v4777_v59 = vpop.f32.mrb[138].mxu0 }
 0x3df   :  { %v4778_v30 = vpop.f32.mrb[139].mxu0 }
 0x3e0   :  { %v4779_v12 = vadd.f32 %v4778_v30, %v4777_v59  ;;  %v6582_v23 = vadd.f32 %v4776_v28, %v6546_v21  ;;  %v5436_v28 = vld [vmem:[%s6947_s6 + $0x110] sm:$0xff]  }
 0x3e2   :  { %v6585_v0 = vadd.f32 %v4779_v12, %v6549_v11 }
 0x3e4   :  { %v4780_v52 = vpop.f32.mrb[140].mxu0 }
 0x3e5   :  { %v4781_v7 = vpop.f32.mrb[141].mxu0 }
 0x3e6   :  { %v4782_v17 = vadd.f32 %v4781_v7, %v4780_v52  ;;  %v4783_v58 = vpop.f32.mrb[142].mxu0 }
 0x3e7   :  { %v4784_v42 = vpop.f32.mrb[143].mxu0 }
 0x3e8   :  { %v4785_v16 = vadd.f32 %v4784_v42, %v4783_v58  ;;  %v6588_v32 = vadd.f32 %v4782_v17, %v6552_v48  ;;  %v5439_v17 = vld [vmem:[%s6947_s6 + $0x198] sm:$0xff]  }
 0x3ea   :  { %v6591_v13 = vadd.f32 %v4785_v16, %v6555_v47 }
 0x3ec   :  { %v5197_v36 = vpop.f32.mrb[144].mxu0 }
 0x3ed   :  { %v2563_v3 = vadd.f32 %v5197_v36, %v2466_v9  ;;  %v2554_v60 = vpop.f32.mrb[145].mxu0  ;;  %v5427_v9 = vld [vmem:[%s6947_s6 + $0x180] sm:$0xff]  }
 0x3ee   :  { %v2555_v21 = vadd.f32 %v2554_v60, %v2458_v2  ;;  %v5198_v40 = vpop.f32.mrb[146].mxu0  ;;  %v5442_v36 = vld [vmem:[%s6947_s6 + $0x160] sm:$0xff]  }
 0x3ef   :  { %v2566_v6 = vadd.f32 %v5198_v40, %v2469_v61  ;;  %v2557_v11 = vpop.f32.mrb[147].mxu0  ;;  %v2619_v44 = vmax.f32 %v2563_v3, 0.0 }
 0x3f0   :  { %v2558_v31 = vadd.f32 %v2557_v11, %v6559_v39  ;;  %v2617_v10 = vmax.f32 %v2555_v21, 0.0  ;;  %v5428_v39 = vld [vmem:[%s6947_s6 + $0x100] sm:$0xff]  }
 0x3f1   :  { %v2620_v38 = vmax.f32 %v2566_v6, 0.0  ;;  %v5443_v6 = vld [vmem:[%s6947_s6 + $0x1a0] sm:$0xff]  }
 0x3f2   :  { %v2618_v43 = vmax.f32 %v2558_v31, 0.0 }
 0x3f3   :  { %v2634_v50 = vpack.c.bf16 %v2620_v38, %v2619_v44  ;;  %v5444_v44 = vld [vmem:[%s6947_s6 + $0x120] sm:$0xff]   ;;  %v5445_v38 = vld [vmem:[%s6947_s6 + $0x1e8] sm:$0xff]  }
 0x3f4   :  { %v2633_v19 = vpack.c.bf16 %v2618_v43, %v2617_v10  ;;  %v5201_v48 = vpop.f32.mrb[148].mxu0  ;;  %v5446_v43 = vld [vmem:[%s6947_s6 + $0x168] sm:$0xff]  }
 0x3f5   :  { %v2579_v4 = vadd.f32 %v5201_v48, %v2482_v29  ;;  %v2570_v25 = vpop.f32.mrb[149].mxu0  ;;  %v2645_v47 = vrot.slane %v2634_v50, 4  ;;  %v5447_v48 = vld [vmem:[%s6947_s6 + $0x1a8] sm:$0xff]  }
 0x3f6   :  { %v2571_v2 = vadd.f32 %v2570_v25, %v2474_v51  ;;  %v5202_v1 = vpop.f32.mrb[150].mxu0  ;;  %v2642_v61 = vrot.slane %v2633_v19, 4 }
 0x3f7   :  { %v2582_v15 = vadd.f32 %v5202_v1, %v2485_v41  ;;  %v2573_v18 = vpop.f32.mrb[151].mxu0  ;;  %3768 = vmatprep.mubr.bf16.mxu0 %v2645_v47  ;;  %v2623_v51 = vmax.f32 %v2579_v4, 0.0  ;;  %v5449_v47 = vld [vmem:[%s6947_s6 + $0x1f0] sm:$0xff]  }
 0x3f8   :  { %v2574_v20 = vadd.f32 %v2573_v18, %v6565_v55  ;;  %3728 = vmatprep.mubr.bf16.mxu1 %v2642_v61  ;;  %3769 = vmatmul.mubr.bf16.vlgmr.msra.gmra.mrb[160].mxu0 %v2634_v50  ;;  %v2621_v22 = vmax.f32 %v2571_v2, 0.0  ;;  %v5433_v55 = vld [vmem:[%s6947_s6 + $0x1d0] sm:$0xff]   ;;  %v5456_v18 = vld [vmem:[%s6947_s6 + $0x138] sm:$0xff]  }
 0x3f9   :  { %v2624_v29 = vmax.f32 %v2582_v15, 0.0  ;;  %4869 = vmatpush3.bf16.msra.mxu0 %v5427_v9  ;;  %3729 = vmatmul.mubr.bf16.vlgmr.msra.gmra.mrb[144].mxu1 %v2633_v19  ;;  %v5450_v9 = vld [vmem:[%s6947_s6 + $0x170] sm:$0xff]   ;;  %v5455_v15 = vld [vmem:[%s6947_s6 + $0x1b8] sm:$0xff]  }
 0x3fa   :  { %v2622_v41 = vmax.f32 %v2574_v20, 0.0  ;;  %4847 = vmatpush3.bf16.msra.mxu1 %v5428_v39  ;;  %4870 = vmatprep.subr.bf16.mxu0 %v5429_v53  ;;  %v5451_v1 = vld [vmem:[%s6947_s6 + $0x1b0] sm:$0xff]   ;;  %v5453_v39 = vld [vmem:[%s6947_s6 + $0x1f8] sm:$0xff]   ;;  %v5458_v20 = vld [vmem:[%s6947_s6 + $0x240] sm:$0xff]  }
 0x3fb   :  { %v6616_v24 = vpack.c.bf16 %v2624_v29, %v2623_v51  ;;  %4848 = vmatprep.subr.bf16.mxu1 %v5430_v27  ;;  %v5452_v61 = vld [vmem:[%s6947_s6 + $0x130] sm:$0xff]   ;;  %v5454_v53 = vld [vmem:[%s6947_s6 + $0x178] sm:$0xff]   ;;  %v5457_v27 = vld [vmem:[%s6947_s6 + $0x2c0] sm:$0xff]  }
 0x3fc   :  { %v6621_v26 = vpack.c.bf16 %v2622_v41, %v2621_v22  ;;  %v5205_v62 = vpop.f32.mrb[152].mxu0  ;;  %v5459_v51 = vld [vmem:[%s6947_s6 + $0x280] sm:$0xff]   ;;  %v5462_v41 = vld [vmem:[%s6947_s6 + $0x248] sm:$0xff]  }
 0x3fd   :  { %v2595_v57 = vadd.f32 %v5205_v62, %v6576_v14  ;;  %4871 = vmatpush3.bf16.msra.mxu0 %v5431_v46  ;;  %v2586_v35 = vpop.f32.mrb[153].mxu0  ;;  %v2651_v33 = vrot.slane %v6616_v24, 4  ;;  %v5437_v14 = vld [vmem:[%s6947_s6 + $0x1d8] sm:$0xff]   ;;  %v5460_v29 = vld [vmem:[%s6947_s6 + $0x200] sm:$0xff]   ;;  %v5461_v46 = vld [vmem:[%s6947_s6 + $0x2c8] sm:$0xff]  }
 0x3fe   :  { %v2587_v63 = vadd.f32 %v2586_v35, %v6570_v34  ;;  %4849 = vmatpush3.bf16.msra.mxu1 %v5432_v8  ;;  %v5206_v45 = vpop.f32.mrb[154].mxu0  ;;  %4872 = vmatprep.subr.bf16.mxu0 %v5433_v55  ;;  %v2648_v56 = vrot.slane %v6621_v26, 4  ;;  %v5438_v34 = vld [vmem:[%s6947_s6 + $0x158] sm:$0xff]   ;;  %v5463_v55 = vld [vmem:[%s6947_s6 + $0x288] sm:$0xff]   ;;  %v5467_v62 = vld [vmem:[%s6947_s6 + $0x290] sm:$0xff]  }
 0x3ff   :  { %v2598_v59 = vadd.f32 %v5206_v45, %v6579_v37  ;;  %v2589_v30 = vpop.f32.mrb[155].mxu0  ;;  %3848 = vmatprep.mubr.bf16.mxu0 %v2651_v33  ;;  %4850 = vmatprep.subr.bf16.mxu1 %v5434_v49  ;;  %v2627_v52 = vmax.f32 %v2595_v57, 0.0  ;;  %v5440_v37 = vld [vmem:[%s6947_s6 + $0x118] sm:$0xff]   ;;  %v5465_v49 = vld [vmem:[%s6947_s6 + $0x2d0] sm:$0xff]   ;;  %v5473_v45 = vld [vmem:[%s6947_s6 + $0x2e0] sm:$0xff]  }
 0x400   :  { %v2590_v12 = vadd.f32 %v2589_v30, %v6573_v5  ;;  %3808 = vmatprep.mubr.bf16.mxu1 %v2648_v56  ;;  %v2625_v58 = vmax.f32 %v2587_v63, 0.0  ;;  %v5441_v5 = vld [vmem:[%s6947_s6 + $0x1e0] sm:$0xff]   ;;  %v5468_v57 = vld [vmem:[%s6947_s6 + $0x210] sm:$0xff]   ;;  %v5469_v35 = vld [vmem:[%s6947_s6 + $0x2d8] sm:$0xff]  }
 0x401   :  { %v2628_v7 = vmax.f32 %v2598_v59, 0.0  ;;  %4873 = vmatpush3.bf16.msra.mxu0 %v5435_v54  ;;  %v5470_v33 = vld [vmem:[%s6947_s6 + $0x258] sm:$0xff]   ;;  %v5474_v56 = vld [vmem:[%s6947_s6 + $0x260] sm:$0xff]   ;;  %v5477_v59 = vld [vmem:[%s6947_s6 + $0x2e8] sm:$0xff]  }
 0x402   :  { %v2626_v42 = vmax.f32 %v2590_v12, 0.0  ;;  %4851 = vmatpush3.bf16.msra.mxu1 %v5436_v28  ;;  %4874 = vmatprep.subr.bf16.mxu0 %v5437_v14  ;;  %v5471_v54 = vld [vmem:[%s6947_s6 + $0x298] sm:$0xff]   ;;  %v5475_v28 = vld [vmem:[%s6947_s6 + $0x2a0] sm:$0xff]   ;;  %v5478_v30 = vld [vmem:[%s6947_s6 + $0x268] sm:$0xff]  }
 0x403   :  { %v6650_v16 = vpack.c.bf16 %v2628_v7, %v2627_v52  ;;  %4852 = vmatprep.subr.bf16.mxu1 %v5438_v34  ;;  %v5472_v63 = vld [vmem:[%s6947_s6 + $0x218] sm:$0xff]   ;;  %v5476_v14 = vld [vmem:[%s6947_s6 + $0x220] sm:$0xff]   ;;  %v5479_v34 = vld [vmem:[%s6947_s6 + $0x2a8] sm:$0xff]  }
 0x404   :  { %v6655_v3 = vpack.c.bf16 %v2626_v42, %v2625_v58  ;;  %v5209_v60 = vpop.f32.mrb[156].mxu0  ;;  %v5480_v12 = vld [vmem:[%s6947_s6 + $0x228] sm:$0xff]   ;;  %v5481_v52 = vld [vmem:[%s6947_s6 + $0x2f0] sm:$0xff]   ;;  %v5485_v42 = vld [vmem:[%s6947_s6 + $0x2f8] sm:$0xff]  }
 0x405   :  { %v2611_v21 = vadd.f32 %v5209_v60, %v6588_v32  ;;  %4875 = vmatpush3.bf16.msra.mxu0 %v5439_v17  ;;  %v2602_v40 = vpop.f32.mrb[157].mxu0  ;;  %v2657_v22 = vrot.slane %v6650_v16, 4  ;;  %v5482_v7 = vld [vmem:[%s6947_s6 + $0x270] sm:$0xff]   ;;  %v5489_v60 = vld [vmem:[%s6947_s6 + $0x3c0] sm:$0xff]  }
 0x406   :  { %v2603_v11 = vadd.f32 %v2602_v40, %v6582_v23  ;;  %4853 = vmatpush3.bf16.msra.mxu1 %v5440_v37  ;;  %v5210_v31 = vpop.f32.mrb[158].mxu0  ;;  %4876 = vmatprep.subr.bf16.mxu0 %v5441_v5  ;;  %v2654_v8 = vrot.slane %v6655_v3, 4  ;;  %v5483_v17 = vld [vmem:[%s6947_s6 + $0x2b0] sm:$0xff]   ;;  %v5486_v37 = vld [vmem:[%s6947_s6 + $0x278] sm:$0xff]   ;;  %v5491_v40 = vld [vmem:[%s6947_s6 + $0x380] sm:$0xff]  }
 0x407   :  { %v2614_v32 = vadd.f32 %v5210_v31, %v6591_v13  ;;  %v2605_v10 = vpop.f32.mrb[159].mxu0  ;;  %4854 = vmatprep.subr.bf16.mxu1 %v5442_v36  ;;  %v2631_v50 = vmax.f32 %v2611_v21, 0.0  ;;  %v5448_v13 = vld [vmem:[%s6947_s6 + $0x128] sm:$0xff]   ;;  %v5484_v58 = vld [vmem:[%s6947_s6 + $0x230] sm:$0xff]   ;;  %v5487_v5 = vld [vmem:[%s6947_s6 + $0x2b8] sm:$0xff]  }
 0x408   :  { %v2606_v23 = vadd.f32 %v2605_v10, %v6585_v0  ;;  %v2629_v4 = vmax.f32 %v2603_v11, 0.0  ;;  %v5488_v36 = vld [vmem:[%s6947_s6 + $0x238] sm:$0xff]   ;;  %v5490_v21 = vld [vmem:[%s6947_s6 + $0x340] sm:$0xff]   ;;  %v5493_v11 = vld [vmem:[%s6947_s6 + $0x3c8] sm:$0xff]  }
 0x409   :  { %v2632_v19 = vmax.f32 %v2614_v32, 0.0  ;;  %4877 = vmatpush3.bf16.msra.mxu0 %v5443_v6  ;;  %v5492_v6 = vld [vmem:[%s6947_s6 + $0x300] sm:$0xff]   ;;  %v5495_v32 = vld [vmem:[%s6947_s6 + $0x388] sm:$0xff]   ;;  %v5497_v10 = vld [vmem:[%s6947_s6 + $0x3d0] sm:$0xff]  }
 0x40a   :  { %v2630_v25 = vmax.f32 %v2606_v23, 0.0  ;;  %4855 = vmatpush3.bf16.msra.mxu1 %v5444_v44  ;;  %4878 = vmatprep.subr.bf16.mxu0 %v5445_v38  ;;  %v5494_v44 = vld [vmem:[%s6947_s6 + $0x348] sm:$0xff]   ;;  %v5500_v23 = vld [vmem:[%s6947_s6 + $0x310] sm:$0xff]  }
 0x40b   :  { %v6682_v0 = vpack.c.bf16 %v2632_v19, %v2631_v50  ;;  %4856 = vmatprep.subr.bf16.mxu1 %v5446_v43  ;;  %v5499_v43 = vld [vmem:[%s6947_s6 + $0x390] sm:$0xff]   ;;  %v5501_v50 = vld [vmem:[%s6947_s6 + $0x3d8] sm:$0xff]  }
 0x40c   :  { %v6687_v2 = vpack.c.bf16 %v2630_v25, %v2629_v4  ;;  %v5502_v19 = vld [vmem:[%s6947_s6 + $0x358] sm:$0xff]   ;;  %v5505_v25 = vld [vmem:[%s6947_s6 + $0x3e0] sm:$0xff]  }
 0x40d   :  { %4879 = vmatpush3.bf16.msra.mxu0 %v5447_v48  ;;  %v2663_v31 = vrot.slane %v6682_v0, 4  ;;  %v5503_v48 = vld [vmem:[%s6947_s6 + $0x398] sm:$0xff]  }
 0x40e   :  { %4857 = vmatpush3.bf16.msra.mxu1 %v5448_v13  ;;  %4880 = vmatprep.subr.bf16.mxu0 %v5449_v47  ;;  %v2660_v38 = vrot.slane %v6687_v2, 4  ;;  %v5504_v4 = vld [vmem:[%s6947_s6 + $0x318] sm:$0xff]   ;;  %v5506_v13 = vld [vmem:[%s6947_s6 + $0x360] sm:$0xff]  }
 0x40f   :  { %4858 = vmatprep.subr.bf16.mxu1 %v5450_v9  ;;  %v5507_v47 = vld [vmem:[%s6947_s6 + $0x3a0] sm:$0xff]  }
 0x410   :  { %v5508_v9 = vld [vmem:[%s6947_s6 + $0x320] sm:$0xff]  }
 0x411   :  { %4881 = vmatpush3.bf16.msra.mxu0 %v5451_v1  ;;  %v5509_v1 = vld [vmem:[%s6947_s6 + $0x3e8] sm:$0xff]  }
 0x412   :  { %4859 = vmatpush3.bf16.msra.mxu1 %v5452_v61  ;;  %4882 = vmatprep.subr.bf16.mxu0 %v5453_v39  ;;  %v5510_v61 = vld [vmem:[%s6947_s6 + $0x368] sm:$0xff]  }
 0x413   :  { %4860 = vmatprep.subr.bf16.mxu1 %v5454_v53  ;;  %v5511_v39 = vld [vmem:[%s6947_s6 + $0x3a8] sm:$0xff]  }
 0x414   :  { %v5512_v53 = vld [vmem:[%s6947_s6 + $0x328] sm:$0xff]  }
 0x415   :  { %4883 = vmatpush3.bf16.msra.mxu0 %v5455_v15  ;;  %v5513_v15 = vld [vmem:[%s6947_s6 + $0x3f0] sm:$0xff]  }
 0x416   :  { %4861 = vmatpush3.bf16.msra.mxu1 %v5456_v18  ;;  %4912 = vmatprep.subr.bf16.mxu0 %v5457_v27  ;;  %v5514_v18 = vld [vmem:[%s6947_s6 + $0x370] sm:$0xff]  }
 0x417   :  { %4890 = vmatprep.subr.bf16.mxu1 %v5458_v20  ;;  %v5515_v27 = vld [vmem:[%s6947_s6 + $0x3b0] sm:$0xff]  }
 0x418   :  { %3849 = vmatmul.mubr.bf16.vlgmr.msra.gmra.mrb[164].mxu0 %v6616_v24  ;;  %v5464_v24 = vld [vmem:[%s6947_s6 + $0x208] sm:$0xff]   ;;  %v5516_v20 = vld [vmem:[%s6947_s6 + $0x330] sm:$0xff]  }
 0x419   :  { %3809 = vmatmul.mubr.bf16.vlgmr.msra.gmra.mrb[148].mxu1 %v6621_v26  ;;  %4913 = vmatpush3.bf16.msra.mxu0 %v5459_v51  ;;  %v5466_v26 = vld [vmem:[%s6947_s6 + $0x250] sm:$0xff]   ;;  %v5517_v51 = vld [vmem:[%s6947_s6 + $0x3f8] sm:$0xff]  }
 0x41a   :  { %3928 = vmatprep.mubr.bf16.mxu0 %v2657_v22  ;;  %4891 = vmatpush3.bf16.msra.mxu1 %v5460_v29  ;;  %v5518_v29 = vld [vmem:[%s6947_s6 + $0x378] sm:$0xff]  }
 0x41b   :  { %3888 = vmatprep.mubr.bf16.mxu1 %v2654_v8  ;;  %4914 = vmatprep.subr.bf16.mxu0 %v5461_v46  ;;  %v5519_v46 = vld [vmem:[%s6947_s6 + $0x3b8] sm:$0xff]   ;;  %v5521_v8 = vld [vmem:[%s6949_s8] sm:$0xff]  }
 0x41c   :  { %4892 = vmatprep.subr.bf16.mxu1 %v5462_v41  ;;  %v5520_v22 = vld [vmem:[%s6947_s6 + $0x338] sm:$0xff]   ;;  %v5529_v41 = vmov 0.0  }
 0x41d   :  { %4915 = vmatpush3.bf16.msra.mxu0 %v5463_v55  ;;  %v5522_v55 = vld [vmem:[%s6949_s8 + $0x8] sm:$0xff]  }
 0x41e   :  { %4893 = vmatpush3.bf16.msra.mxu1 %v5464_v24  ;;  %4916 = vmatprep.subr.bf16.mxu0 %v5465_v49  ;;  %v5523_v24 = vld [vmem:[%s6949_s8 + $0x10] sm:$0xff]   ;;  %v5526_v49 = vld [vmem:[%s6949_s8 + $0x28] sm:$0xff]  }
 0x41f   :  { %4894 = vmatprep.subr.bf16.mxu1 %v5466_v26  ;;  %v5527_v26 = vld [vmem:[%s6949_s8 + $0x30] sm:$0xff]  }
 0x421   :  { %4917 = vmatpush3.bf16.msra.mxu0 %v5467_v62  ;;  %v5528_v62 = vld [vmem:[%s6949_s8 + $0x38] sm:$0xff]  }
 0x422   :  { %4895 = vmatpush3.bf16.msra.mxu1 %v5468_v57  ;;  %4918 = vmatprep.subr.bf16.mxu0 %v5469_v35 }
 0x423   :  { %4896 = vmatprep.subr.bf16.mxu1 %v5470_v33 }
 0x425   :  { %4919 = vmatpush3.bf16.msra.mxu0 %v5471_v54 }
 0x426   :  { %4897 = vmatpush3.bf16.msra.mxu1 %v5472_v63  ;;  %4920 = vmatprep.subr.bf16.mxu0 %v5473_v45  ;;  %v4296_v63 = vld [vmem:[%s6950_s7] ss:$0 sm:$0xff] }
 0x427   :  { %4898 = vmatprep.subr.bf16.mxu1 %v5474_v56 }
 0x429   :  { %4921 = vmatpush3.bf16.msra.mxu0 %v5475_v28 }
 0x42a   :  { %4899 = vmatpush3.bf16.msra.mxu1 %v5476_v14  ;;  %4922 = vmatprep.subr.bf16.mxu0 %v5477_v59 }
 0x42b   :  { %4900 = vmatprep.subr.bf16.mxu1 %v5478_v30 }
 0x42d   :  { %4923 = vmatpush3.bf16.msra.mxu0 %v5479_v34 }
 0x42e   :  { %4901 = vmatpush3.bf16.msra.mxu1 %v5480_v12  ;;  %4924 = vmatprep.subr.bf16.mxu0 %v5481_v52 }
 0x42f   :  { %4902 = vmatprep.subr.bf16.mxu1 %v5482_v7 }
 0x431   :  { %4925 = vmatpush3.bf16.msra.mxu0 %v5483_v17 }
 0x432   :  { %4903 = vmatpush3.bf16.msra.mxu1 %v5484_v58  ;;  %4926 = vmatprep.subr.bf16.mxu0 %v5485_v42 }
 0x433   :  { %4904 = vmatprep.subr.bf16.mxu1 %v5486_v37 }
 0x435   :  { %4927 = vmatpush3.bf16.msra.mxu0 %v5487_v5 }
 0x436   :  { %4905 = vmatpush3.bf16.msra.mxu1 %v5488_v36  ;;  %4956 = vmatprep.subr.bf16.mxu0 %v5489_v60 }
 0x437   :  { %4934 = vmatprep.subr.bf16.mxu1 %v5490_v21 }
 0x438   :  { %3929 = vmatmul.mubr.bf16.vlgmr.msra.gmra.mrb[168].mxu0 %v6650_v16  ;;  %v5496_v16 = vld [vmem:[%s6947_s6 + $0x308] sm:$0xff]  }
 0x439   :  { %3889 = vmatmul.mubr.bf16.vlgmr.msra.gmra.mrb[152].mxu1 %v6655_v3  ;;  %4957 = vmatpush3.bf16.msra.mxu0 %v5491_v40  ;;  %v5498_v3 = vld [vmem:[%s6947_s6 + $0x350] sm:$0xff]  }
 0x43a   :  { %4008 = vmatprep.mubr.bf16.mxu0 %v2663_v31  ;;  %4935 = vmatpush3.bf16.msra.mxu1 %v5492_v6 }
 0x43b   :  { %3968 = vmatprep.mubr.bf16.mxu1 %v2660_v38  ;;  %4958 = vmatprep.subr.bf16.mxu0 %v5493_v11 }
 0x43c   :  { %4936 = vmatprep.subr.bf16.mxu1 %v5494_v44 }
 0x43d   :  { %4959 = vmatpush3.bf16.msra.mxu0 %v5495_v32 }
 0x43e   :  { %4937 = vmatpush3.bf16.msra.mxu1 %v5496_v16  ;;  %4960 = vmatprep.subr.bf16.mxu0 %v5497_v10 }
 0x43f   :  { %4938 = vmatprep.subr.bf16.mxu1 %v5498_v3 }
 0x441   :  { %4961 = vmatpush3.bf16.msra.mxu0 %v5499_v43 }
 0x442   :  { %4939 = vmatpush3.bf16.msra.mxu1 %v5500_v23  ;;  %4962 = vmatprep.subr.bf16.mxu0 %v5501_v50 }
 0x443   :  { %4940 = vmatprep.subr.bf16.mxu1 %v5502_v19 }
 0x445   :  { %4963 = vmatpush3.bf16.msra.mxu0 %v5503_v48 }
 0x446   :  { %4941 = vmatpush3.bf16.msra.mxu1 %v5504_v4  ;;  %4964 = vmatprep.subr.bf16.mxu0 %v5505_v25 }
 0x447   :  { %4942 = vmatprep.subr.bf16.mxu1 %v5506_v13 }
 0x449   :  { %4965 = vmatpush3.bf16.msra.mxu0 %v5507_v47 }
 0x44a   :  { %4943 = vmatpush3.bf16.msra.mxu1 %v5508_v9  ;;  %4966 = vmatprep.subr.bf16.mxu0 %v5509_v1 }
 0x44b   :  { %4944 = vmatprep.subr.bf16.mxu1 %v5510_v61 }
 0x44d   :  { %4967 = vmatpush3.bf16.msra.mxu0 %v5511_v39 }
 0x44e   :  { %4945 = vmatpush3.bf16.msra.mxu1 %v5512_v53  ;;  %4968 = vmatprep.subr.bf16.mxu0 %v5513_v15 }
 0x44f   :  { %4946 = vmatprep.subr.bf16.mxu1 %v5514_v18 }
 0x451   :  { %4969 = vmatpush3.bf16.msra.mxu0 %v5515_v27 }
 0x452   :  { %4947 = vmatpush3.bf16.msra.mxu1 %v5516_v20  ;;  %4970 = vmatprep.subr.bf16.mxu0 %v5517_v51  ;;  %v4425_v51 = vld [vmem:[%s6951_s9] ss:$0 sm:$0xff] }
 0x453   :  { %4948 = vmatprep.subr.bf16.mxu1 %v5518_v29 }
 0x455   :  { %4971 = vmatpush3.bf16.msra.mxu0 %v5519_v46 }
 0x456   :  { %4949 = vmatpush3.bf16.msra.mxu1 %v5520_v22 }
 0x457   :  { %5211 = vmatprep.subr.bf16.mxu1 %v5529_v41 }
 0x458   :  { %4009 = vmatmul.mubr.bf16.vlgmr.msra.gmra.mrb[172].mxu0 %v6682_v0  ;;  %v5524_v0 = vld [vmem:[%s6949_s8 + $0x18] sm:$0xff]  }
 0x459   :  { %3969 = vmatmul.mubr.bf16.vlgmr.msra.gmra.mrb[156].mxu1 %v6687_v2  ;;  %v5525_v2 = vld [vmem:[%s6949_s8 + $0x20] sm:$0xff]  }
 0x45a   :  { %5212 = vmatpush3.bf16.msra.mxu1 %v5521_v8  ;;  %5227 = vmatprep.mubr.msk.bf16.mxu1 %vm5530_vm0, %v5529_v41 }
 0x45b   :  { %5213 = vmatprep.subr.bf16.mxu1 %v5529_v41 }
 0x45e   :  { %5214 = vmatpush3.bf16.msra.mxu1 %v5522_v55 }
 0x45f   :  { %5215 = vmatprep.subr.bf16.mxu1 %v5529_v41 }
 0x462   :  { %5216 = vmatpush3.bf16.msra.mxu1 %v5523_v24 }
 0x463   :  { %5217 = vmatprep.subr.bf16.mxu1 %v5529_v41 }
 0x466   :  { %5218 = vmatpush3.bf16.msra.mxu1 %v5524_v0 }
 0x467   :  { %5219 = vmatprep.subr.bf16.mxu1 %v5529_v41 }
 0x46a   :  { %5220 = vmatpush3.bf16.msra.mxu1 %v5525_v2 }
 0x46b   :  { %5221 = vmatprep.subr.bf16.mxu1 %v5529_v41 }
 0x46e   :  { %5222 = vmatpush3.bf16.msra.mxu1 %v5526_v49 }
 0x46f   :  { %5223 = vmatprep.subr.bf16.mxu1 %v5529_v41 }
 0x472   :  { %5224 = vmatpush3.bf16.msra.mxu1 %v5527_v26 }
 0x473   :  { %5225 = vmatprep.subr.bf16.mxu1 %v5529_v41 }
 0x476   :  { %5226 = vmatpush3.bf16.msra.mxu1 %v5528_v62 }
 0x4cb   :  { %v4840_v57 = vpop.f32.mrb[160].mxu0 }
 0x4cc   :  { %v4818_v35 = vpop.f32.mrb[144].mxu1  ;;  %v4841_v33 = vpop.f32.mrb[161].mxu0 }
 0x4cd   :  { %v4842_v54 = vadd.f32 %v4841_v33, %v4840_v57  ;;  %v4819_v45 = vpop.f32.mrb[145].mxu1  ;;  %v4843_v56 = vpop.f32.mrb[162].mxu0 }
 0x4ce   :  { %v4820_v28 = vadd.f32 %v4819_v45, %v4818_v35  ;;  %v4821_v14 = vpop.f32.mrb[146].mxu1  ;;  %v4844_v59 = vpop.f32.mrb[163].mxu0 }
 0x4cf   :  { %v4822_v30 = vpop.f32.mrb[147].mxu1 }
 0x4d0   :  { %v3731_v34 = vadd.f32 %v4820_v28, %v4296_v63 }
 0x4d2   :  { %v3771_v12 = vadd.f32 %v4842_v54, %v3731_v34 }
 0x4eb   :  { %v4884_v52 = vpop.f32.mrb[164].mxu0 }
 0x4ec   :  { %v4862_v7 = vpop.f32.mrb[148].mxu1  ;;  %v4885_v17 = vpop.f32.mrb[165].mxu0 }
 0x4ed   :  { %v4886_v58 = vadd.f32 %v4885_v17, %v4884_v52  ;;  %v4863_v42 = vpop.f32.mrb[149].mxu1  ;;  %v4887_v37 = vpop.f32.mrb[166].mxu0 }
 0x4ee   :  { %v4864_v5 = vadd.f32 %v4863_v42, %v4862_v7  ;;  %v4865_v36 = vpop.f32.mrb[150].mxu1  ;;  %v4888_v60 = vpop.f32.mrb[167].mxu0 }
 0x4ef   :  { %v4866_v21 = vpop.f32.mrb[151].mxu1 }
 0x4f0   :  { %v3811_v40 = vadd.f32 %v4864_v5, %v3771_v12 }
 0x4f2   :  { %v3851_v6 = vadd.f32 %v4886_v58, %v3811_v40 }
 0x50b   :  { %v4928_v11 = vpop.f32.mrb[168].mxu0 }
 0x50c   :  { %v4906_v31 = vpop.f32.mrb[152].mxu1  ;;  %v4929_v44 = vpop.f32.mrb[169].mxu0 }
 0x50d   :  { %v4930_v38 = vadd.f32 %v4929_v44, %v4928_v11  ;;  %v4907_v32 = vpop.f32.mrb[153].mxu1  ;;  %v4931_v16 = vpop.f32.mrb[170].mxu0 }
 0x50e   :  { %v4908_v10 = vadd.f32 %v4907_v32, %v4906_v31  ;;  %v4909_v3 = vpop.f32.mrb[154].mxu1  ;;  %v4932_v43 = vpop.f32.mrb[171].mxu0 }
 0x50f   :  { %v4910_v23 = vpop.f32.mrb[155].mxu1 }
 0x510   :  { %v3891_v50 = vadd.f32 %v4908_v10, %v3851_v6 }
 0x512   :  { %v3931_v19 = vadd.f32 %v4930_v38, %v3891_v50 }
 0x52b   :  { %v4972_v48 = vpop.f32.mrb[172].mxu0 }
 0x52c   :  { %v4950_v4 = vpop.f32.mrb[156].mxu1  ;;  %v4973_v25 = vpop.f32.mrb[173].mxu0 }
 0x52d   :  { %v4974_v13 = vadd.f32 %v4973_v25, %v4972_v48  ;;  %v4951_v47 = vpop.f32.mrb[157].mxu1  ;;  %v4975_v9 = vpop.f32.mrb[174].mxu0 }
 0x52e   :  { %v4952_v1 = vadd.f32 %v4951_v47, %v4950_v4  ;;  %v4953_v61 = vpop.f32.mrb[158].mxu1  ;;  %v4976_v39 = vpop.f32.mrb[175].mxu0 }
 0x52f   :  { %v4954_v53 = vpop.f32.mrb[159].mxu1 }
 0x530   :  { %v3971_v15 = vadd.f32 %v4952_v1, %v3931_v19 }
 0x532   :  { %v4011_v18 = vadd.f32 %v4974_v13, %v3971_v15 }
 0x534   :  { %v4016_v27 = vmax.f32 %v4011_v18, 0.0 }
 0x536   :  { %v4017_v20 = vpack.c.bf16 %v4016_v27, %v4016_v27 }
 0x538   :  { %5228 = vmatmul.mubr.bf16.vlgmr.msra.gmra.mrb[160].mxu1 %v4017_v20 }
 0x60b   :  { %v4123_v29 = vpop.f32.mrb[160].mxu1 }
 0x60c   :  { %v4124_v46 = vadd.f32 %v4425_v51, %v4123_v29  ;;  %v5229_v22 = vpop.f32.mrb[161].mxu1 }
 0x60d   :  { %v4126_v41 = vpop.f32.mrb[162].mxu1 }
 0x60e   :  { %4129 = vst [vmem:[%s6952_s10] sm:$0xff] %v4124_v46  ;;  %v5230_v8 = vpop.f32.mrb[163].mxu1 }

</bundles_post_ra>
